<compile_context>
chip_gen: v5e
topology: v5e:2x2
jax: 0.10.0
libtpu: 0.0.40
codegen_flags: <defaults>
</compile_context>

<pallas_src>
import math

import jax
import jax.numpy as jnp
from jax import lax
from jax.experimental import pallas as pl
from jax.experimental.pallas import tpu as pltpu


def _make_kernel(Bt, S, H, temper, fused_proj):
    inv_temper = 1.0 / float(temper)

    def kernel(h_ref, adj_ref, w_ref, p_ref, o_ref):
        h = h_ref[...].astype(jnp.float32)        # (Bt, S, H)
        adj = adj_ref[...].astype(jnp.float32)    # (Bt, S, S)

        # ---- get_att: batched h @ h^T (no explicit transpose) ---------------
        u = jnp.einsum('bid,bjd->bij', h, h,
                       preferred_element_type=jnp.float32) * inv_temper  # (Bt,S,S)
        u = u - jnp.max(u, axis=-1, keepdims=True)          # stable softmax
        e = jnp.exp(u)
        inv_z = pl.reciprocal(jnp.sum(e, axis=-1, keepdims=True))        # exact
        scores = e * inv_z
        delta = scores * adj
        inv_d = pl.reciprocal(jnp.sum(delta, axis=-1, keepdims=True) + 1e-10)
        att = delta * inv_d                                              # (Bt,S,S)

        # ---- the three Linear projections ------------------------------------
        bl = p_ref[0:1, :]   # (1, H)
        bs = p_ref[1:2, :]
        br = p_ref[2:3, :]
        h2 = h.reshape(Bt * S, H)
        if fused_proj:
            # H multiple of 128: fused matmul, tile-aligned lane slices.
            proj = jnp.dot(h2, w_ref[...], preferred_element_type=jnp.float32)
            hl = (proj[:, 0:H] + bl).reshape(Bt, S, H)
            hs = (proj[:, H:2 * H] + bs).reshape(Bt, S, H)
            hr = (proj[:, 2 * H:3 * H] + br).reshape(Bt, S, H)
        else:
            # H < 128: stacked (3,H,H) weights, three clean 2-D matmuls, no
            # sub-128-lane slicing of the result.
            hl = (jnp.dot(h2, w_ref[0], preferred_element_type=jnp.float32)
                  + bl).reshape(Bt, S, H)
            hs = (jnp.dot(h2, w_ref[1], preferred_element_type=jnp.float32)
                  + bs).reshape(Bt, S, H)
            hr = (jnp.dot(h2, w_ref[2], preferred_element_type=jnp.float32)
                  + br).reshape(Bt, S, H)

        # ---- split attention: masks are batch-invariant (S,S) ----------------
        row = lax.broadcasted_iota(jnp.int32, (S, S), 0)
        col = lax.broadcasted_iota(jnp.int32, (S, S), 1)
        att_left = jnp.where(col > row, att, 0.0)    # triu(att, 1)
        att_right = jnp.where(col < row, att, 0.0)   # strictly lower
        diag = jnp.sum(jnp.where(col == row, att, 0.0),
                       axis=-1, keepdims=True)       # (Bt, S, 1)

        # ---- context: two MXU matmuls + a VPU diagonal scale ------------------
        ctx = (jnp.einsum('bij,bjd->bid', att_left, hl,
                          preferred_element_type=jnp.float32)
               + jnp.einsum('bij,bjd->bid', att_right, hr,
                            preferred_element_type=jnp.float32)
               + diag * hs)                                              # (Bt,S,H)

        # ---- BertLayerNorm (eps = 1e-12) + ReLU -------------------------------
        gamma = p_ref[3:4, :]
        beta = p_ref[4:5, :]
        mu = jnp.mean(ctx, axis=-1, keepdims=True)
        var = jnp.mean((ctx - mu) ** 2, axis=-1, keepdims=True)
        xn = (ctx - mu) * lax.rsqrt(var + 1e-12)
        o = gamma * xn + beta
        o_ref[...] = jnp.maximum(o, 0.0).astype(o_ref.dtype)

    return kernel


def _choose_bt(B, S, H, *, min_rows=128, max_rows=512,
               vmem_budget_bytes=12 << 20):
    """Pick the batch block so Bt*S lands in [min_rows, max_rows] rows.

    Capped by a conservative per-block f32 VMEM estimate (double-buffered I/O +
    resident (Bt,S,S)/(Bt,S,H) temporaries) that fits every generation's default
    scoped VMEM (incl. v5e's 16 MiB and v7x's 32 MiB) without extra flags.
    """
    bt = max(1, min(B, max(1, max_rows // max(S, 1))))
    per_elem_bytes = 4 * (8 * S * H + 6 * S * S)
    bt = max(1, min(bt, vmem_budget_bytes // max(per_elem_bytes, 1)))
    # Keep >= 2 grid steps when each step still has >= min_rows rows, so v7x's
    # two TensorCores both receive blocks; on 1-TC parts the extra step costs
    # only ~0.35us.
    if bt >= B and B > 1:
        half = -(-B // 2)
        if half * S >= min_rows:
            bt = half
    return bt


def digcn_layer_att(hidden, adj, w_left, b_left, w_self, b_self,
                    w_right, b_right, gamma, beta, *, bt=None):
    B, S, H = hidden.shape
    temper = float(H) ** 0.5
    if bt is None:
        bt = _choose_bt(B, S, H)

    # Pad B up to a multiple of bt (avoids the Bt=1 perf cliff for awkward B).
    Bp = -(-B // bt) * bt
    if Bp != B:
        pad = Bp - B
        hidden_p = jnp.concatenate(
            [hidden, jnp.zeros((pad, S, H), hidden.dtype)], axis=0)
        adj_p = jnp.concatenate(
            [adj, jnp.zeros((pad, S, S), adj.dtype)], axis=0)
    else:
        hidden_p, adj_p = hidden, adj

    fused_proj = (H % 128 == 0)
    if fused_proj:
        # x @ [Wl^T | Ws^T | Wr^T], slices tile-aligned since H % 128 == 0.
        w = jnp.concatenate([jnp.asarray(w_left).T,
                             jnp.asarray(w_self).T,
                             jnp.asarray(w_right).T], axis=1).astype(jnp.float32)
        w_spec = pl.BlockSpec((H, 3 * H), lambda b: (0, 0))
    else:
        w = jnp.stack([jnp.asarray(w_left).T,
                       jnp.asarray(w_self).T,
                       jnp.asarray(w_right).T], axis=0).astype(jnp.float32)
        w_spec = pl.BlockSpec((3, H, H), lambda b: (0, 0, 0))

    # One (8, H) parameter block: rows 0-2 biases, 3 gamma, 4 beta, 5-7 pad.
    zeros_h = jnp.zeros((H,), jnp.float32)
    p = jnp.stack([jnp.asarray(b_left, jnp.float32),
                   jnp.asarray(b_self, jnp.float32),
                   jnp.asarray(b_right, jnp.float32),
                   jnp.asarray(gamma, jnp.float32),
                   jnp.asarray(beta, jnp.float32),
                   zeros_h, zeros_h, zeros_h], axis=0)

    kernel = _make_kernel(bt, S, H, temper, fused_proj)

    out = pl.pallas_call(
        kernel,
        out_shape=jax.ShapeDtypeStruct((Bp, S, H), hidden.dtype),
        grid_spec=pltpu.PrefetchScalarGridSpec(
            num_scalar_prefetch=0,
            grid=(Bp // bt,),
            in_specs=[
                pl.BlockSpec((bt, S, H), lambda b: (b, 0, 0)),   # hidden_state
                pl.BlockSpec((bt, S, S), lambda b: (b, 0, 0)),   # adjacency
                w_spec,                                          # projection weights
                pl.BlockSpec((8, H), lambda b: (0, 0)),          # packed params
            ],
            out_specs=pl.BlockSpec((bt, S, H), lambda b: (b, 0, 0)),
        ),
        compiler_params=pltpu.CompilerParams(
            dimension_semantics=("parallel",)),
    )(hidden_p, adj_p, w, p)

    return out if Bp == B else out[:B]


def _reference(hidden, adj, w_left, b_left, w_self, b_self, w_right, b_right,
               gamma, beta):
    """Pure-JAX replica of the PyTorch forward, for correctness checking."""
    temper = float(hidden.shape[-1]) ** 0.5
    h = hidden.astype(jnp.float32)
    u = jnp.einsum('bid,bjd->bij', h, h) / temper
    scores = jax.nn.softmax(u, axis=-1)
    delta = scores * adj
    att = delta / (jnp.sum(delta, axis=-1, keepdims=True) + 1e-10)

    hl = h @ w_left.T + b_left
    hs = h @ w_self.T + b_self
    hr = h @ w_right.T + b_right

    att_left = jnp.triu(att, k=1)
    att_self = jnp.triu(att, k=0) - att_left
    att_right = att - jnp.triu(att, k=0)
    ctx = (jnp.einsum('bij,bjd->bid', att_left, hl)
           + jnp.einsum('bij,bjd->bid', att_self, hs)
           + jnp.einsum('bij,bjd->bid', att_right, hr))
    mu = ctx.mean(-1, keepdims=True)
    var = ((ctx - mu) ** 2).mean(-1, keepdims=True)
    o = gamma * (ctx - mu) / jnp.sqrt(var + 1e-12) + beta
    return jnp.maximum(o, 0.0)


if __name__ == "__main__":
    B, S, H = 16, 16, 32
    key = jax.random.PRNGKey(0)
    keys = jax.random.split(key, 12)

    hidden = jax.random.normal(keys[0], (B, S, H), dtype=jnp.float32)
    # Random 0/1 directed adjacency (float, matching torch.mul semantics).
    adj = (jax.random.uniform(keys[1], (B, S, S)) > 0.5).astype(jnp.float32)

    # Deterministic parameter init (xavier-normal-ish weights, uniform biases),
    # mirroring reset_parameters() shapes.
    std = math.sqrt(2.0 / (H + H))
    bound = 1.0 / math.sqrt(H)
    w_left = std * jax.random.normal(keys[2], (H, H), dtype=jnp.float32)
    w_self = std * jax.random.normal(keys[3], (H, H), dtype=jnp.float32)
    w_right = std * jax.random.normal(keys[4], (H, H), dtype=jnp.float32)
    b_left = jax.random.uniform(keys[5], (H,), minval=-bound, maxval=bound)
    b_self = jax.random.uniform(keys[6], (H,), minval=-bound, maxval=bound)
    b_right = jax.random.uniform(keys[7], (H,), minval=-bound, maxval=bound)
    gamma = jnp.ones((H,), dtype=jnp.float32)
    beta = jnp.zeros((H,), dtype=jnp.float32)

    # Main check: B=16 -> Bt=8 (128 rows/step), grid=(2,) so both v7x TCs get work.
    out = digcn_layer_att(hidden, adj, w_left, b_left, w_self, b_self,
                          w_right, b_right, gamma, beta)
    out = jax.block_until_ready(out)
    ref = _reference(hidden, adj, w_left, b_left, w_self, b_self,
                     w_right, b_right, gamma, beta)
    assert out.shape == (B, S, H)
    assert jnp.allclose(out, ref, atol=1e-4, rtol=1e-4), "mismatch vs reference"

    # Robustness check: awkward batch (B=17 -> Bt=9, padded to 18, grid=(2,)).
    B2 = 17
    hidden2 = jax.random.normal(keys[10], (B2, S, H), dtype=jnp.float32)
    adj2 = (jax.random.uniform(keys[11], (B2, S, S)) > 0.5).astype(jnp.float32)
    out2 = jax.block_until_ready(
        digcn_layer_att(hidden2, adj2, w_left, b_left, w_self, b_self,
                        w_right, b_right, gamma, beta))
    ref2 = _reference(hidden2, adj2, w_left, b_left, w_self, b_self,
                      w_right, b_right, gamma, beta)
    assert out2.shape == (B2, S, H)
    assert jnp.allclose(out2, ref2, atol=1e-4, rtol=1e-4), "mismatch (padded batch)"

    print("KERNEL_OK")
</pallas_src>

<mosaic_0001>
module attributes {stable_mosaic.version = 11 : i64} {
  func.func @kernel(%arg0: i32, %arg1: memref<8x16x32xf32, #tpu.memory_space<vmem>>, %arg2: memref<8x16x16xf32, #tpu.memory_space<vmem>>, %arg3: memref<3x32x32xf32, #tpu.memory_space<vmem>>, %arg4: memref<8x32xf32, #tpu.memory_space<vmem>>, %arg5: memref<8x16x32xf32, #tpu.memory_space<vmem>>) attributes {dimension_semantics = [#tpu.dimension_semantics<parallel>], iteration_bounds = array<i64: 2>, scalar_prefetch = 0 : i64, scratch_operands = 0 : i64, tpu.core_type = #tpu.core_type<tc>, window_params = [{transform_indices = @transform_0, window_bounds = array<i64: 8, 16, 32>}, {transform_indices = @transform_1, window_bounds = array<i64: 8, 16, 16>}, {pipeline_mode = #tpu.pipeline_mode<synchronous>, transform_indices = @transform_2, window_bounds = array<i64: 3, 32, 32>}, {pipeline_mode = #tpu.pipeline_mode<synchronous>, transform_indices = @transform_3, window_bounds = array<i64: 8, 32>}, {transform_indices = @transform_4, window_bounds = array<i64: 8, 16, 32>}]} {
    %c0 = arith.constant 0 : index
    %c0_0 = arith.constant 0 : index
    %c0_1 = arith.constant 0 : index
    %0 = vector.load %arg1[%c0, %c0_0, %c0_1] : memref<8x16x32xf32, #tpu.memory_space<vmem>>, vector<8x16x32xf32>
    %c0_2 = arith.constant 0 : index
    %c0_3 = arith.constant 0 : index
    %c0_4 = arith.constant 0 : index
    %1 = vector.load %arg2[%c0_2, %c0_3, %c0_4] : memref<8x16x16xf32, #tpu.memory_space<vmem>>, vector<8x16x16xf32>
    "tpu.trace_start"() <{level = 10 : i32, message = "bid,bjd->bij"}> : () -> ()
    %cst = arith.constant dense<0.000000e+00> : vector<8x16x16xf32>
    %2 = tpu.matmul %0, %0, %cst {dimension_numbers = #tpu.dot_dimension_numbers<[2], [2], [1], [1], [0, 0, 0, 1, 1, 1], [0], [0]>} : vector<8x16x32xf32>, vector<8x16x32xf32>, vector<8x16x16xf32> -> vector<8x16x16xf32>
    "tpu.trace_stop"() : () -> ()
    %cst_5 = arith.constant 0.176776692 : f32
    %3 = vector.broadcast %cst_5 : f32 to vector<8x16x16xf32>
    %4 = arith.mulf %2, %3 : vector<8x16x16xf32>
    %cst_6 = arith.constant dense<0xFF800000> : vector<8x16xf32>
    %5 = vector.multi_reduction <maximumf>, %4, %cst_6 [2] : vector<8x16x16xf32> to vector<8x16xf32>
    %6 = vector.shape_cast %5 : vector<8x16xf32> to vector<8x16x1xf32>
    %7 = vector.broadcast %6 : vector<8x16x1xf32> to vector<8x16x16xf32>
    %8 = arith.subf %4, %7 : vector<8x16x16xf32>
    %9 = math.exp %8 : vector<8x16x16xf32>
    %cst_7 = arith.constant dense<0.000000e+00> : vector<8x16xf32>
    %10 = vector.multi_reduction <add>, %9, %cst_7 [2] : vector<8x16x16xf32> to vector<8x16xf32>
    %11 = vector.shape_cast %10 : vector<8x16xf32> to vector<8x16x1xf32>
    %12 = tpu.reciprocal %11 : vector<8x16x1xf32> -> vector<8x16x1xf32>
    %13 = vector.broadcast %12 : vector<8x16x1xf32> to vector<8x16x16xf32>
    %14 = arith.mulf %9, %13 : vector<8x16x16xf32>
    %15 = arith.mulf %14, %1 : vector<8x16x16xf32>
    %cst_8 = arith.constant dense<0.000000e+00> : vector<8x16xf32>
    %16 = vector.multi_reduction <add>, %15, %cst_8 [2] : vector<8x16x16xf32> to vector<8x16xf32>
    %17 = vector.shape_cast %16 : vector<8x16xf32> to vector<8x16x1xf32>
    %cst_9 = arith.constant 1.000000e-10 : f32
    %18 = vector.broadcast %cst_9 : f32 to vector<8x16x1xf32>
    %19 = arith.addf %17, %18 : vector<8x16x1xf32>
    %20 = tpu.reciprocal %19 : vector<8x16x1xf32> -> vector<8x16x1xf32>
    %21 = vector.broadcast %20 : vector<8x16x1xf32> to vector<8x16x16xf32>
    %22 = arith.mulf %15, %21 : vector<8x16x16xf32>
    %c0_10 = arith.constant 0 : index
    %c0_11 = arith.constant 0 : index
    %23 = vector.load %arg4[%c0_10, %c0_11] : memref<8x32xf32, #tpu.memory_space<vmem>>, vector<1x32xf32>
    %c1 = arith.constant 1 : index
    %c0_12 = arith.constant 0 : index
    %24 = vector.load %arg4[%c1, %c0_12] : memref<8x32xf32, #tpu.memory_space<vmem>>, vector<1x32xf32>
    %c2 = arith.constant 2 : index
    %c0_13 = arith.constant 0 : index
    %25 = vector.load %arg4[%c2, %c0_13] : memref<8x32xf32, #tpu.memory_space<vmem>>, vector<1x32xf32>
    %26 = vector.shape_cast %0 : vector<8x16x32xf32> to vector<128x32xf32>
    %c0_14 = arith.constant 0 : index
    %c0_15 = arith.constant 0 : index
    %c0_16 = arith.constant 0 : index
    %27 = vector.load %arg3[%c0_14, %c0_15, %c0_16] : memref<3x32x32xf32, #tpu.memory_space<vmem>>, vector<1x32x32xf32>
    %28 = vector.shape_cast %27 : vector<1x32x32xf32> to vector<32x32xf32>
    %cst_17 = arith.constant dense<0.000000e+00> : vector<128x32xf32>
    %29 = tpu.matmul %26, %28, %cst_17 {dimension_numbers = #tpu.dot_dimension_numbers<[1], [0], [0], [1], [0, 0, 1, 1], [], []>} : vector<128x32xf32>, vector<32x32xf32>, vector<128x32xf32> -> vector<128x32xf32>
    %30 = vector.broadcast %23 : vector<1x32xf32> to vector<128x32xf32>
    %31 = arith.addf %29, %30 : vector<128x32xf32>
    %32 = vector.shape_cast %31 : vector<128x32xf32> to vector<8x16x32xf32>
    %c1_18 = arith.constant 1 : index
    %c0_19 = arith.constant 0 : index
    %c0_20 = arith.constant 0 : index
    %33 = vector.load %arg3[%c1_18, %c0_19, %c0_20] : memref<3x32x32xf32, #tpu.memory_space<vmem>>, vector<1x32x32xf32>
    %34 = vector.shape_cast %33 : vector<1x32x32xf32> to vector<32x32xf32>
    %cst_21 = arith.constant dense<0.000000e+00> : vector<128x32xf32>
    %35 = tpu.matmul %26, %34, %cst_21 {dimension_numbers = #tpu.dot_dimension_numbers<[1], [0], [0], [1], [0, 0, 1, 1], [], []>} : vector<128x32xf32>, vector<32x32xf32>, vector<128x32xf32> -> vector<128x32xf32>
    %36 = vector.broadcast %24 : vector<1x32xf32> to vector<128x32xf32>
    %37 = arith.addf %35, %36 : vector<128x32xf32>
    %38 = vector.shape_cast %37 : vector<128x32xf32> to vector<8x16x32xf32>
    %c2_22 = arith.constant 2 : index
    %c0_23 = arith.constant 0 : index
    %c0_24 = arith.constant 0 : index
    %39 = vector.load %arg3[%c2_22, %c0_23, %c0_24] : memref<3x32x32xf32, #tpu.memory_space<vmem>>, vector<1x32x32xf32>
    %40 = vector.shape_cast %39 : vector<1x32x32xf32> to vector<32x32xf32>
    %cst_25 = arith.constant dense<0.000000e+00> : vector<128x32xf32>
    %41 = tpu.matmul %26, %40, %cst_25 {dimension_numbers = #tpu.dot_dimension_numbers<[1], [0], [0], [1], [0, 0, 1, 1], [], []>} : vector<128x32xf32>, vector<32x32xf32>, vector<128x32xf32> -> vector<128x32xf32>
    %42 = vector.broadcast %25 : vector<1x32xf32> to vector<128x32xf32>
    %43 = arith.addf %41, %42 : vector<128x32xf32>
    %44 = vector.shape_cast %43 : vector<128x32xf32> to vector<8x16x32xf32>
    %45 = tpu.iota {dimensions = array<i32: 0>} : vector<16x16xi32>
    %46 = tpu.iota {dimensions = array<i32: 1>} : vector<16x16xi32>
    %47 = arith.cmpi sgt, %46, %45 : vector<16x16xi32>
    %cst_26 = arith.constant 0.000000e+00 : f32
    %48 = vector.shape_cast %47 : vector<16x16xi1> to vector<1x16x16xi1>
    %49 = vector.broadcast %48 : vector<1x16x16xi1> to vector<8x16x16xi1>
    %50 = vector.broadcast %cst_26 : f32 to vector<8x16x16xf32>
    %51 = arith.select %49, %22, %50 : vector<8x16x16xi1>, vector<8x16x16xf32>
    %52 = arith.cmpi slt, %46, %45 : vector<16x16xi32>
    %cst_27 = arith.constant 0.000000e+00 : f32
    %53 = vector.shape_cast %52 : vector<16x16xi1> to vector<1x16x16xi1>
    %54 = vector.broadcast %53 : vector<1x16x16xi1> to vector<8x16x16xi1>
    %55 = vector.broadcast %cst_27 : f32 to vector<8x16x16xf32>
    %56 = arith.select %54, %22, %55 : vector<8x16x16xi1>, vector<8x16x16xf32>
    %57 = arith.cmpi eq, %46, %45 : vector<16x16xi32>
    %cst_28 = arith.constant 0.000000e+00 : f32
    %58 = vector.shape_cast %57 : vector<16x16xi1> to vector<1x16x16xi1>
    %59 = vector.broadcast %58 : vector<1x16x16xi1> to vector<8x16x16xi1>
    %60 = vector.broadcast %cst_28 : f32 to vector<8x16x16xf32>
    %61 = arith.select %59, %22, %60 : vector<8x16x16xi1>, vector<8x16x16xf32>
    %cst_29 = arith.constant dense<0.000000e+00> : vector<8x16xf32>
    %62 = vector.multi_reduction <add>, %61, %cst_29 [2] : vector<8x16x16xf32> to vector<8x16xf32>
    %63 = vector.shape_cast %62 : vector<8x16xf32> to vector<8x16x1xf32>
    "tpu.trace_start"() <{level = 10 : i32, message = "bij,bjd->bid"}> : () -> ()
    %cst_30 = arith.constant dense<0.000000e+00> : vector<8x16x32xf32>
    %64 = tpu.matmul %51, %32, %cst_30 {dimension_numbers = #tpu.dot_dimension_numbers<[2], [1], [1], [2], [0, 0, 0, 1, 1, 2], [0], [0]>} : vector<8x16x16xf32>, vector<8x16x32xf32>, vector<8x16x32xf32> -> vector<8x16x32xf32>
    %cst_31 = arith.constant dense<0.000000e+00> : vector<8x16x32xf32>
    %65 = tpu.matmul %56, %44, %cst_31 {dimension_numbers = #tpu.dot_dimension_numbers<[2], [1], [1], [2], [0, 0, 0, 1, 1, 2], [0], [0]>} : vector<8x16x16xf32>, vector<8x16x32xf32>, vector<8x16x32xf32> -> vector<8x16x32xf32>
    "tpu.trace_stop"() : () -> ()
    %66 = arith.addf %64, %65 : vector<8x16x32xf32>
    %67 = vector.broadcast %63 : vector<8x16x1xf32> to vector<8x16x32xf32>
    %68 = arith.mulf %67, %38 : vector<8x16x32xf32>
    %69 = arith.addf %66, %68 : vector<8x16x32xf32>
    %c3 = arith.constant 3 : index
    %c0_32 = arith.constant 0 : index
    %70 = vector.load %arg4[%c3, %c0_32] : memref<8x32xf32, #tpu.memory_space<vmem>>, vector<1x32xf32>
    %c4 = arith.constant 4 : index
    %c0_33 = arith.constant 0 : index
    %71 = vector.load %arg4[%c4, %c0_33] : memref<8x32xf32, #tpu.memory_space<vmem>>, vector<1x32xf32>
    %cst_34 = arith.constant dense<0.000000e+00> : vector<8x16xf32>
    %72 = vector.multi_reduction <add>, %69, %cst_34 [2] : vector<8x16x32xf32> to vector<8x16xf32>
    %73 = vector.shape_cast %72 : vector<8x16xf32> to vector<8x16x1xf32>
    %cst_35 = arith.constant 3.200000e+01 : f32
    %74 = vector.broadcast %cst_35 : f32 to vector<8x16x1xf32>
    %75 = arith.divf %73, %74 : vector<8x16x1xf32>
    %76 = vector.broadcast %75 : vector<8x16x1xf32> to vector<8x16x32xf32>
    %77 = arith.subf %69, %76 : vector<8x16x32xf32>
    %78 = arith.mulf %77, %77 : vector<8x16x32xf32>
    %cst_36 = arith.constant dense<0.000000e+00> : vector<8x16xf32>
    %79 = vector.multi_reduction <add>, %78, %cst_36 [2] : vector<8x16x32xf32> to vector<8x16xf32>
    %80 = vector.shape_cast %79 : vector<8x16xf32> to vector<8x16x1xf32>
    %cst_37 = arith.constant 3.200000e+01 : f32
    %81 = vector.broadcast %cst_37 : f32 to vector<8x16x1xf32>
    %82 = arith.divf %80, %81 : vector<8x16x1xf32>
    %83 = vector.broadcast %75 : vector<8x16x1xf32> to vector<8x16x32xf32>
    %84 = arith.subf %69, %83 : vector<8x16x32xf32>
    %cst_38 = arith.constant 9.99999996E-13 : f32
    %85 = vector.broadcast %cst_38 : f32 to vector<8x16x1xf32>
    %86 = arith.addf %82, %85 : vector<8x16x1xf32>
    %87 = math.rsqrt %86 : vector<8x16x1xf32>
    %88 = vector.broadcast %87 : vector<8x16x1xf32> to vector<8x16x32xf32>
    %89 = arith.mulf %84, %88 : vector<8x16x32xf32>
    %90 = vector.shape_cast %70 : vector<1x32xf32> to vector<1x1x32xf32>
    %91 = vector.broadcast %90 : vector<1x1x32xf32> to vector<8x16x32xf32>
    %92 = arith.mulf %91, %89 : vector<8x16x32xf32>
    %93 = vector.shape_cast %71 : vector<1x32xf32> to vector<1x1x32xf32>
    %94 = vector.broadcast %93 : vector<1x1x32xf32> to vector<8x16x32xf32>
    %95 = arith.addf %92, %94 : vector<8x16x32xf32>
    %cst_39 = arith.constant 0.000000e+00 : f32
    %96 = vector.broadcast %cst_39 : f32 to vector<8x16x32xf32>
    %97 = arith.maximumf %95, %96 : vector<8x16x32xf32>
    %c0_40 = arith.constant 0 : index
    %c0_41 = arith.constant 0 : index
    %c0_42 = arith.constant 0 : index
    %98 = vector.load %arg5[%c0_40, %c0_41, %c0_42] : memref<8x16x32xf32, #tpu.memory_space<vmem>>, vector<8x16x32xf32>
    tpu.vector_store %arg5[%c0_40, %c0_41, %c0_42], %97 {strides = array<i32>} : memref<8x16x32xf32, #tpu.memory_space<vmem>>, vector<8x16x32xf32>,
    return
  }
  func.func @transform_0(%arg0: i32) -> (i32, i32, i32) {
    %c0_i32 = arith.constant 0 : i32
    %c0_i32_0 = arith.constant 0 : i32
    %c0_i32_1 = arith.constant 0 : i32
    return %arg0, %c0_i32, %c0_i32_0 : i32, i32, i32
  }
  func.func @transform_1(%arg0: i32) -> (i32, i32, i32) {
    %c0_i32 = arith.constant 0 : i32
    %c0_i32_0 = arith.constant 0 : i32
    %c0_i32_1 = arith.constant 0 : i32
    return %arg0, %c0_i32, %c0_i32_0 : i32, i32, i32
  }
  func.func @transform_2(%arg0: i32) -> (i32, i32, i32) {
    %c0_i32 = arith.constant 0 : i32
    %c0_i32_0 = arith.constant 0 : i32
    %c0_i32_1 = arith.constant 0 : i32
    %c0_i32_2 = arith.constant 0 : i32
    return %c0_i32, %c0_i32_0, %c0_i32_1 : i32, i32, i32
  }
  func.func @transform_3(%arg0: i32) -> (i32, i32) {
    %c0_i32 = arith.constant 0 : i32
    %c0_i32_0 = arith.constant 0 : i32
    %c0_i32_1 = arith.constant 0 : i32
    return %c0_i32, %c0_i32_0 : i32, i32
  }
  func.func @transform_4(%arg0: i32) -> (i32, i32, i32) {
    %c0_i32 = arith.constant 0 : i32
    %c0_i32_0 = arith.constant 0 : i32
    %c0_i32_1 = arith.constant 0 : i32
    return %arg0, %c0_i32, %c0_i32_0 : i32, i32, i32
  }
}

</mosaic_0001>

<bundles_post_ra>
// kernel: tpu_custom_call.1
= control target key start
LH: loop header
LB: loop body
LE: loop exit
PB: predicated region body
PF: predicated region fallthrough
CT: control target
= control target key end

     0   :  { %s5132_s0 = inlined_call_operand.hbm [shape: f32[16,16,32], index: 0, kind: input, shape index: {}]   ;;  %s5133_s1 = inlined_call_operand.hbm [shape: f32[16,16,16], index: 1, kind: input, shape index: {}]   ;;  %s5134_s2 = inlined_call_operand.hbm [shape: f32[3,32,32], index: 2, kind: input, shape index: {}]   ;;  %s5135_s3 = inlined_call_operand.hbm [shape: f32[8,32], index: 3, kind: input, shape index: {}]   ;;  %s5136_s4 = inlined_call_operand.hbm [shape: f32[16,16,32], index: 4, kind: output, shape index: {}]  }
   0x1   :  { %5145 = sst [smem:[#allocation20_spill]] %s5132_s0 }
   0x2   :  { %5146 = sst [smem:[#allocation21_spill]] %s5134_s2 }
   0x3   :  { %5147 = sst [smem:[#allocation22_spill]] %s5135_s3 }
   0x4   :  { %9 = vsyncpa [#allocation3], 0 }
   0x5   :  { %11 = vsyncpa [#allocation3 + $0x1], 0 }
   0x6   :  { %12 = vsyncpa [#allocation6], 0 }
   0x7   :  { %14 = vsyncpa [#allocation6 + $0x1], 0 }
   0x8   :  { %15 = vsyncpa [#allocation9], 0 }
   0x9   :  { %16 = vsyncpa [#allocation4], 0 }
   0xa   :  { %18 = vsyncpa [#allocation4 + $0x1], 0  ;;  %s3260_s15 = smov 0   ;;  %s3262_s16 = smov 0  }
   0xb   :  { %s3264_s17 = smov 0   ;;  %s3266_s18 = smov 0  }
   0xc LB: > { %s3281_s19 = sadd.s32 4294967295, %s3226_s18   ;;  %s2671_s20 = sadd.s32 4294967294, %s3226_s18   ;;  %s3226_s18 = sphi %s3266_s18, %s5230_s18   ;;  %s3222_s17 = sphi %s3264_s17, %s5229_s17   ;;  %s3218_s16 = sphi %s3262_s16, %s5228_s16   ;;  %s3214_s15 = sphi %s3260_s15, %s5227_s15  }
   0xd   : > { %p44_p0 = scmp.ne.s32.totalorder %s3218_s16, %s3214_s15  ;;  %p45_p1 = scmp.eq.s32.totalorder %s3281_s19, 0 }
   0xe   : > { %p136_p2 = scmp.eq.s32.totalorder %s3281_s19, 1  ;;  %p142_p3 = scmp.eq.s32.totalorder %s2671_s20, 1 }
   0xf   : > { %p3290_p4 = por %p45_p1, %p44_p0  ;;  %p2672_p5 = scmp.ge.s32.totalorder %s3226_s18, 1 }
  0x10   : > { %p3295_p6 = por %p142_p3, %p44_p0  ;;  %p149_p7 = scmp.lt.s32.totalorder %s3226_s18, 3 }
  0x11   : > { %s5150_s2 = sld [smem:[#allocation21_spill]]  ;;  %s3228_s27 = smov [#allocation7]  }
  0x12   : > { %p3303_p8 = pnand %p2672_p5, %p149_p7  ;;  %s162_s28 = sshll.u32 %s3228_s27, 4  ;;  %s163_s28 = int_to_ptr.vmem [resolvable:$true] %s162_s28 }
  0x13   : > { %s5152_s3 = sld [smem:[#allocation22_spill]]  ;;  %s5137_s6 = smov 128  }
  0x14   : > { %p2828_p9 = pneg %p3303_p8  ;;  %s5139_s7 = smov 8  }
  0x15   : > { %s3231_s8 = smov [#allocation8]   ;;  %s3319_s10 = sadd.s32 1, %s3226_s18  }
  0x16   : > { %p2829_p10 = pnand %p2828_p9, %p45_p1  ;;  %s177_s9 = sshll.u32 %s3231_s8, 4  ;;  %s178_s9 = int_to_ptr.vmem [resolvable:$true] %s177_s9 }
  0x17   : > { %s160_s25 = sshll.u32 %s5150_s2, 4  ;;  %s31_s11 = sadd.s32 1, %s3222_s17  ;;  %s161_s25 = int_to_ptr.hbm [resolvable:$true] %s160_s25 }
  0x18   : > { %2831 = dma.hbm_to_vmem [thread:$0]  (!%p2829_p10), %s161_s25, 1536, %s163_s28, [#allocation6], %s5137_s6, %s5137_s6, %s5139_s7  }
  0x19   : > { %s175_s5 = sshll.u32 %s5152_s3, 4  ;;  %s28_s12 = ssub.s32 %s3226_s18, %s3319_s10  ;;  %s176_s5 = int_to_ptr.hbm [resolvable:$true] %s175_s5 }
  0x1a   : > { %2834 = dma.hbm_to_vmem [thread:$0]  (!%p2829_p10), %s176_s5, 128, %s178_s9, [#allocation9]  }
  0x1b   : > { %p38_p12 = scmp.ne.s32.totalorder %s3222_s17, %s3218_s16  ;;  %p29_p13 = scmp.eq.s32.totalorder %s28_s12, 0 }
  0x1c   : > { %p39_p0 = scmp.eq.s32.totalorder %s3226_s18, 0  ;;  %p2848_p5 = scmp.lt.s32.totalorder %s3226_s18, 2 }
  0x1d   : > { %p3329_p3 = por %p136_p2, %p38_p12  ;;  %s188_s20 = sand.u32 1, %s3222_s17  }
  0x1e   : > { %s3335_s14 = scalar_select %p29_p13, %s3222_s17, %s31_s11  }
  0x1f   : > { %p40_p7 = por %p39_p0, %p38_p12  ;;  %s3338_s23 = sshll.u32 %s188_s20, 7 }
  0x20   : > { %s2809_s24 = sshll.u32 %s3226_s18, 7  ;;  %s5154_s0 = sld [smem:[#allocation20_spill]] }
  0x21   : > { %s192_s29 = scalar_lea.vmem [#allocation2], %s3338_s23  ;;  %p3345_p2 = pnand %p2848_p5, %p40_p7 }
  0x22   : > { %s201_s30 = sshll.u32 %s192_s29, 4  ;;  %s221_s12 = scalar_lea.hbm %s5133_s1, %s2809_s24  ;;  %s202_s30 = int_to_ptr.vmem [resolvable:$true] %s201_s30 }
  0x23   : > { %s222_s6 = sshll.u32 %s221_s12, 4  ;;  %s189_s7 = scalar_lea.sflag [#allocation3], %s188_s20  ;;  %s223_s6 = int_to_ptr.hbm [resolvable:$true] %s222_s6 }
  0x24   : > { %p3092_p10 = pneg %p3345_p2 }
  0x26   : > { %s198_s28 = scalar_lea.hbm %s5154_s0, %s2809_s24  ;;  %s3095_s29 = scalar_lea.hbm %s5154_s0, 256 }
  0x27   : > { %s199_s5 = sshll.u32 %s198_s28, 4  ;;  %s200_s5 = int_to_ptr.hbm [resolvable:$true] %s199_s5 }
  0x28   : > { %s3088_s2 = sshra.s32 %s200_s5, 4  ;;  %s3089_s2 = int_to_ptr.hbm [resolvable:$true] %s3088_s2 }
  0x29   : > { %s3090_s25 = scalar_lea.hbm %s3089_s2, 128  ;;  %p3096_p0 = scmp.lt.s32.totalorder %s3089_s2, %s5154_s0 }
  0x2a   : > { %p3091_p9 = scmp.ne.s32.totalorder %s3089_s2, %s3090_s25  ;;  %p3097_p5 = scmp.lt.s32.totalorder %s3095_s29, %s3090_s25 }
  0x2c   : > { %p3093_p12 = pnand %p3092_p10, %p3091_p9  ;;  %p3098_p7 = por %p3097_p5, %p3096_p0 }
  0x2e   : > { %p3094_p13 = pneg %p3093_p12 }
  0x30   : > { %p3099_p11 = pnand %p3098_p7, %p3094_p13 }
  0x32   : > { %3102 = shalt.err (!%p3099_p11)
}
  0x33   : > { %s5156_s20 = smov 8   ;;  %s5157_s24 = smov 128  }
  0x34   : > { %2838 = dma.hbm_to_vmem [thread:$0]  (!%p3345_p2), %s200_s5, 2048, %s202_s30, %s189_s7, %s5157_s24, %s5157_s24, %s5156_s20  }
  0x35   : > { %s215_s12 = scalar_lea.vmem [#allocation5], %s3338_s23  ;;  %s211_s28 = sand.u32 1, %s3226_s18  }
  0x36   : > { %s224_s27 = sshll.u32 %s215_s12, 4  ;;  %s212_s9 = scalar_lea.sflag [#allocation6], %s211_s28  ;;  %s225_s27 = int_to_ptr.vmem [resolvable:$true] %s224_s27 }
  0x37   : > { %s3118_s2 = sshra.s32 %s223_s6, 4  ;;  %s3125_s0 = scalar_lea.hbm %s5133_s1, 256  ;;  %s3119_s2 = int_to_ptr.hbm [resolvable:$true] %s3118_s2 }
  0x38   : > { %s3120_s25 = scalar_lea.hbm %s3119_s2, 128  ;;  %p3126_p13 = scmp.lt.s32.totalorder %s3119_s2, %s5133_s1 }
  0x39   : > { %p3121_p9 = scmp.ne.s32.totalorder %s3119_s2, %s3120_s25  ;;  %p3127_p0 = scmp.lt.s32.totalorder %s3125_s0, %s3120_s25 }
  0x3b   : > { %p3123_p11 = pnand %p3121_p9, %p3092_p10  ;;  %p3128_p5 = por %p3127_p0, %p3126_p13 }
  0x3d   : > { %p3124_p12 = pneg %p3123_p11 }
  0x3f   : > { %p3129_p7 = pnand %p3128_p5, %p3124_p12 }
  0x41   : > { %3132 = shalt.err (!%p3129_p7)
}
  0x42   : > { %2841 = dma.hbm_to_vmem [thread:$0]  (!%p3345_p2), %s223_s6, 2048, %s225_s27, %s212_s9, %s5157_s24, %s5157_s24, %s5156_s20  }
  0x43   : > { %236 = sbr.rel (%p3303_p8) target bundleno = 1271 (0x4f7), region = 36 }
  0x48   : > { %s3387_s23 = sand.u32 1, %s3218_s16  }
  0x49   : > { %s3390_s3 = sshll.u32 %s3387_s23, 7  ;;  %s239_s0 = scalar_lea.sflag [#allocation3], %s3387_s23 }
  0x4a   : > { %s3394_s30 = scalar_lea.vmem [#allocation2], %s3390_s3 }
  0x4b   : > { %3193 = dma.done.wait (%p3290_p4), %s239_s0, 2048  }
  0x4c   : > { %3195 = vsyncadd (%p3290_p4), %s239_s0, 4294965248  ;;  %s248_s26 = sand.u32 1, %s3281_s19   ;;  %s3402_s5 = scalar_lea.vmem [#allocation5], %s3390_s3 }
  0x4d   : > { %s249_s6 = scalar_lea.sflag [#allocation6], %s248_s26 }
  0x4e   : > { %3197 = dma.done.wait (%p3290_p4), %s249_s6, 2048  }
  0x4f   : > { %3199 = vsyncadd (%p3290_p4), %s249_s6, 4294965248 }
  0x50   : > { %3201 = dma.done.wait (%p45_p1), [#allocation6], 1536  }
  0x51   : > { %3203 = vsyncadd (%p45_p1), [#allocation6], 4294965760 }
  0x52   : > { %3205 = dma.done.wait (%p45_p1), [#allocation9], 128  }
  0x53   : > { %3207 = vsyncadd (%p45_p1), [#allocation9], 4294967168  ;;  %vm328_vm0 = vcmask 261120   ;;  %v3417_v0 = vld [vmem:[%s3394_s30 + $0x8] sm:$0xff]  ;;  %v3420_v1 = vld [vmem:[%s3394_s30 + $0x18] sm:$0xff]  ;;  %vm577_vm1 = vcmask 130048  }
  0x54   : > { %v3423_v2 = vld [vmem:[%s3394_s30 + $0x28] sm:$0xff]  ;;  %2690 = vmatpush.xpose.msk.msra.mxu0 %vm328_vm0, %v3417_v0  ;;  %2694 = vmatpush.xpose.msk.msra.mxu1 %vm328_vm0, %v3420_v1  ;;  %v3430_v3 = vld [vmem:[%s3394_s30] sm:$0xff]  ;;  %v3433_v4 = vld [vmem:[%s3394_s30 + $0x10] sm:$0xff]  ;;  %s5007_s21 = scalar_lea.vmem [#allocation10], %s3390_s3  ;;  %s2813_s8 = sshll.u32 %s3281_s19, 7 }
  0x55   : > { %2698 = vmatpush.xpose.msk.msra.mxu2 %vm328_vm0, %v3423_v2  ;;  %v3438_v5 = vld [vmem:[%s3394_s30 + $0x20] sm:$0xff]  ;;  %v3441_v6 = vld [vmem:[%s3394_s30 + $0x38] sm:$0xff]  ;;  %v3444_v7 = vld [vmem:[%s3394_s30 + $0x48] sm:$0xff]  ;;  %s2552_s12 = scalar_lea.hbm %s5136_s4, %s2813_s8  ;;  %s2553_s19 = sshll.u32 %s5007_s21, 4  ;;  %s2554_s19 = int_to_ptr.vmem [resolvable:$true] %s2553_s19 }
  0x56   : > { %2702 = vmatpush.xpose.msk.msra.mxu3 %vm328_vm0, %v3441_v6  ;;  %v3449_v8 = vld [vmem:[%s3394_s30 + $0x30] sm:$0xff]  ;;  %v3478_v9 = vld [vmem:[%s3394_s30 + $0x58] sm:$0xff]  ;;  %v3483_v10 = vld [vmem:[%s3394_s30 + $0x40] sm:$0xff]  ;;  %s2555_s27 = sshll.u32 %s2552_s12, 4  ;;  %s2540_s28 = scalar_lea.sflag [#allocation4], %s3387_s23  ;;  %s2556_s27 = int_to_ptr.hbm [resolvable:$true] %s2555_s27 }
  0x57   : > { %v3488_v11 = vld [vmem:[%s3394_s30 + $0x68] sm:$0xff]  ;;  %v3493_v12 = vld [vmem:[%s3394_s30 + $0x50] sm:$0xff]  ;;  %v3500_v13 = vld [vmem:[%s3394_s30 + $0x60] sm:$0xff]  ;;  %s3162_s9 = sshra.s32 %s2556_s27, 4  ;;  %s3168_s11 = scalar_lea.hbm %s5136_s4, 256  ;;  %s3163_s9 = int_to_ptr.hbm [resolvable:$true] %s3162_s9 }
  0x58   : > { %2691 = vmatpush.xpose.msk.msra.mxu0 %vm328_vm0, %v3430_v3  ;;  %2695 = vmatpush.xpose.msk.msra.mxu1 %vm328_vm0, %v3433_v4  ;;  %v3515_v14 = vld [vmem:[%s3394_s30 + $0x78] sm:$0xff]  ;;  %v3520_v15 = vld [vmem:[%s3394_s30 + $0x70] sm:$0xff]  ;;  %s3164_s2 = scalar_lea.hbm %s3163_s9, 128  ;;  %p3169_p2 = scmp.lt.s32.totalorder %s3163_s9, %s5136_s4 }
  0x59   : > { %2699 = vmatpush.xpose.msk.msra.mxu2 %vm328_vm0, %v3438_v5  ;;  %p3165_p1 = scmp.ne.s32.totalorder %s3163_s9, %s3164_s2  ;;  %p3170_p10 = scmp.lt.s32.totalorder %s3168_s11, %s3164_s2 }
  0x5a   : > { %2703 = vmatpush.xpose.msk.msra.mxu3 %vm328_vm0, %v3449_v8 }
  0x5b   : > { %2692 = vmatmul.msk.f32.vlgmr.msra.gmra.mxu0 %vm328_vm0, %v3430_v3  ;;  %2696 = vmatmul.msk.f32.vlgmr.msra.gmra.mxu1 %vm328_vm0, %v3433_v4  ;;  %p3166_p4 = pnand %p3165_p1, %p3329_p3  ;;  %p3171_p9 = por %p3170_p10, %p3169_p2 }
  0x5c   : > { %2706 = vmatpush.xpose.msk.msrb.mxu0 %vm328_vm0, %v3444_v7  ;;  %2700 = vmatmul.msk.f32.vlgmr.msra.gmra.mxu2 %vm328_vm0, %v3438_v5 }
  0x5d   : > { %2704 = vmatmul.msk.f32.vlgmr.msra.gmra.mxu3 %vm328_vm0, %v3449_v8  ;;  %2710 = vmatpush.xpose.msk.msrb.mxu1 %vm328_vm0, %v3478_v9  ;;  %p3167_p8 = pneg %p3166_p4 }
  0x5e   : > { %2714 = vmatpush.xpose.msk.msrb.mxu2 %vm328_vm0, %v3488_v11  ;;  %2718 = vmatpush.xpose.msk.msrb.mxu3 %vm328_vm0, %v3515_v14 }
  0x5f   : > { %p3172_p11 = pnand %p3171_p9, %p3167_p8 }
  0x60   : > { %2707 = vmatpush.xpose.msk.msrb.mxu0 %vm328_vm0, %v3483_v10 }
  0x61   : > { %2711 = vmatpush.xpose.msk.msrb.mxu1 %vm328_vm0, %v3493_v12 }
  0x62   : > { %2715 = vmatpush.xpose.msk.msrb.mxu2 %vm328_vm0, %v3500_v13  ;;  %2719 = vmatpush.xpose.msk.msrb.mxu3 %vm328_vm0, %v3520_v15 }
  0x63   : > { %2693 = vmatmul.msk.f32.gmra.mxu0 %vm328_vm0, %v3417_v0  ;;  %2697 = vmatmul.msk.f32.gmra.mxu1 %vm328_vm0, %v3420_v1 }
  0x64   : > { %2701 = vmatmul.msk.f32.gmra.mxu2 %vm328_vm0, %v3423_v2 }
  0x65   : > { %2705 = vmatmul.msk.f32.gmra.mxu3 %vm328_vm0, %v3441_v6 }
  0x6b   : > { %2708 = vmatmul.msk.f32.vlgmr.msrb.gmra.mxu0 %vm328_vm0, %v3483_v10  ;;  %2712 = vmatmul.msk.f32.vlgmr.msrb.gmra.mxu1 %vm328_vm0, %v3493_v12 }
  0x6c   : > { %2716 = vmatmul.msk.f32.vlgmr.msrb.gmra.mxu2 %vm328_vm0, %v3500_v13 }
  0x6d   : > { %2720 = vmatmul.msk.f32.vlgmr.msrb.gmra.mxu3 %vm328_vm0, %v3520_v15 }
  0x73   : > { %2709 = vmatmul.msk.f32.gmra.mxu0 %vm328_vm0, %v3444_v7  ;;  %2713 = vmatmul.msk.f32.gmra.mxu1 %vm328_vm0, %v3478_v9 }
  0x74   : > { %2717 = vmatmul.msk.f32.gmra.mxu2 %vm328_vm0, %v3488_v11 }
  0x75   : > { %2721 = vmatmul.msk.f32.gmra.mxu3 %vm328_vm0, %v3515_v14 }
  0xd8   : > { %v352_v16 = vpop.f32.mrf.mxu0  ;;  %v381_v17 = vpop.f32.mrf.mxu1 }
  0xd9   : > { %v561_v18 = vmul.f32 0.17677669, %v352_v16  ;;  %v563_v19 = vmul.f32 0.17677669, %v381_v17 }
  0xdb   : > { %v584_v20 = vsel %vm577_vm1, %v563_v19, -inf  ;;  %v578_v21 = vsel %vm577_vm1, %v561_v18, -inf }
  0xdc   : > { %585 = vmax.xlane.f32.xlu1 %v584_v20  ;;  %579 = vmax.xlane.f32.xlu0 %v578_v21 }
  0xdf   : > { %v410_v22 = vpop.f32.mrf.mxu2 }
  0xe0   : > { %v3528_v23 = vmul.f32 0.17677669, %v410_v22  ;;  %v355_v24 = vpop.f32.mrf.mxu0  ;;  %v384_v25 = vpop.f32.mrf.mxu1 }
  0xe1   : > { %v562_v26 = vmul.f32 0.17677669, %v355_v24  ;;  %v564_v27 = vmul.f32 0.17677669, %v384_v25  ;;  %v439_v28 = vpop.f32.mrf.mxu3 }
  0xe2   : > { %v590_v29 = vsel %vm577_vm1, %v3528_v23, -inf  ;;  %v3536_v32 = vmul.f32 0.17677669, %v439_v28 }
  0xe3   : > { %591 = vmax.xlane.f32.xlu2 %v590_v29  ;;  %v587_v30 = vsel %vm577_vm1, %v564_v27, -inf  ;;  %v581_v31 = vsel %vm577_vm1, %v562_v26, -inf }
  0xe4   : > { %588 = vmax.xlane.f32.xlu1 %v587_v30  ;;  %582 = vmax.xlane.f32.xlu0 %v581_v31  ;;  %v596_v35 = vsel %vm577_vm1, %v3536_v32, -inf }
  0xe7   : > { %v413_v33 = vpop.f32.mrf.mxu2 }
  0xe8   : > { %v566_v34 = vmul.f32 0.17677669, %v413_v33  ;;  %v468_v50 = vpop.f32.mrf.mxu0  ;;  %v497_v54 = vpop.f32.mrf.mxu1 }
  0xe9   : > { %v442_v36 = vpop.f32.mrf.mxu3  ;;  %v3553_v58 = vmul.f32 0.17677669, %v497_v54  ;;  %v3555_v61 = vmul.f32 0.17677669, %v468_v50 }
  0xea   : > { %v593_v37 = vsel %vm577_vm1, %v566_v34, -inf  ;;  %v3541_v38 = vmul.f32 0.17677669, %v442_v36  ;;  %v1288_v36 = vld [vmem:[#allocation7 + $0x18] sm:$0xff] }
  0xeb   : > { %594 = vmax.xlane.f32.xlu2 %v593_v37  ;;  %v608_v17 = vsel %vm577_vm1, %v3553_v58, -inf  ;;  %1302 = vmatpush.msra.mxu0 %v1288_v36 }
  0xec   : > { %597 = vmax.xlane.f32.xlu0 %v596_v35  ;;  %v599_v39 = vsel %vm577_vm1, %v3541_v38, -inf }
  0xef   : > { %v526_v63 = vpop.f32.mrf.mxu2 }
  0xf0   : > { %v471_v21 = vpop.f32.mrf.mxu0  ;;  %v500_v33 = vpop.f32.mrf.mxu1 }
  0xf1   : > { %v3566_v24 = vmul.f32 0.17677669, %v471_v21  ;;  %v3581_v37 = vmul.f32 0.17677669, %v500_v33  ;;  %v1359_v21 = vld [vmem:[#allocation7 + $0x38] sm:$0xff] }
  0xf2   : > { %1373 = vmatpush.msra.mxu1 %v1359_v21 }
  0xf3   : > { %600 = vmax.xlane.f32.xlu2 %v599_v39  ;;  %v605_v29 = vsel %vm577_vm1, %v3566_v24, -inf }
 0x14f   : > { %v586_v40 = vpop.xlane.xlu1 %585  ;;  %v580_v41 = vpop.xlane.xlu0 %579 }
 0x150   : > { %v628_v42 = vsub.f32 %v563_v19, %v586_v40  ;;  %v626_v43 = vsub.f32 %v561_v18, %v580_v41  ;;  %v602_v18 = vsel %vm577_vm1, %v3555_v61, -inf }
 0x152   : > { %v646_v44 = vmul.f32 1.442695, %v628_v42  ;;  %v642_v45 = vmul.f32 1.442695, %v626_v43  ;;  %v611_v42 = vsel %vm577_vm1, %v3581_v37, -inf }
 0x154   : > { %2896 = vpow2.f32 %v646_v44 }
 0x155   : > { %2898 = vpow2.f32 %v642_v45  ;;  %v3592_v45 = vmul.f32 0.17677669, %v526_v63  ;;  %v1285_v63 = vld [vmem:[#allocation7] sm:$0xff] }
 0x156   : > { %v592_v46 = vpop.xlane.xlu2 %591 }
 0x157   : > { %v589_v47 = vpop.xlane.xlu1 %588  ;;  %v583_v48 = vpop.xlane.xlu0 %582  ;;  %v630_v20 = vsub.f32 %v3528_v23, %v592_v46 }
 0x158   : > { %v627_v49 = vsub.f32 %v562_v26, %v583_v48  ;;  %v629_v52 = vsub.f32 %v564_v27, %v589_v47  ;;  %v529_v23 = vpop.f32.mrf.mxu2  ;;  %v555_v48 = vpop.f32.mrf.mxu3 }
 0x159   : > { %v650_v25 = vmul.f32 1.442695, %v630_v20  ;;  %v3579_v35 = vmul.f32 0.17677669, %v529_v23  ;;  %v1427_v20 = vld [vmem:[#allocation7 + $0x40] sm:$0xff] }
 0x15a   : > { %v3545_v51 = vpop.eup %2896  ;;  %v644_v53 = vmul.f32 1.442695, %v627_v49  ;;  %v648_v59 = vmul.f32 1.442695, %v629_v52  ;;  %v614_v49 = vsel %vm577_vm1, %v3592_v45, -inf  ;;  %v1356_v23 = vld [vmem:[#allocation7 + $0x20] sm:$0xff] }
 0x15b   : > { %v3547_v55 = vpop.eup %2898  ;;  %v680_v56 = vsel %vm577_vm1, %v3545_v51, 0.0 }
 0x15c   : > { %681 = vadd.xlane.f32.xlu2 %v680_v56  ;;  %v674_v57 = vsel %vm577_vm1, %v3547_v55, 0.0  ;;  %2900 = vpow2.f32 %v644_v53 }
 0x15d   : > { %675 = vadd.xlane.f32.xlu1 %v674_v57  ;;  %2902 = vpow2.f32 %v648_v59 }
 0x15e   : > { %v595_v60 = vpop.xlane.xlu2 %594 }
 0x15f   : > { %v631_v62 = vsub.f32 %v566_v34, %v595_v60  ;;  %v598_v27 = vpop.xlane.xlu0 %597  ;;  %v1287_v60 = vld [vmem:[#allocation7 + $0x10] sm:$0xff] }
 0x160   : > { %v632_v30 = vsub.f32 %v3536_v32, %v598_v27  ;;  %v617_v32 = vsel %vm577_vm1, %v3579_v35, -inf  ;;  %v558_v54 = vpop.f32.mrf.mxu3  ;;  %1303 = vmatpush.msra.mxu0 %v1287_v60  ;;  %v1357_v27 = vld [vmem:[#allocation7 + $0x28] sm:$0xff] }
 0x161   : > { %v652_v16 = vmul.f32 1.442695, %v631_v62  ;;  %v3608_v57 = vmul.f32 0.17677669, %v558_v54  ;;  %v1286_v62 = vld [vmem:[#allocation7 + $0x8] sm:$0xff] }
 0x162   : > { %v3561_v19 = vpop.eup %2900  ;;  %v654_v39 = vmul.f32 1.442695, %v632_v30  ;;  %1304 = vmatpush.msra.mxu0 %v1286_v62 }
 0x163   : > { %2904 = vpow2.f32 %v652_v16  ;;  %v677_v22 = vsel %vm577_vm1, %v3561_v19, 0.0  ;;  %v3568_v26 = vpop.eup %2902  ;;  %v623_v59 = vsel %vm577_vm1, %v3608_v57, -inf  ;;  %v1430_v16 = vld [vmem:[#allocation7 + $0x58] sm:$0xff] }
 0x164   : > { %609 = vmax.xlane.f32.xlu2 %v608_v17  ;;  %678 = vadd.xlane.f32.xlu0 %v677_v22  ;;  %2906 = vpow2.f32 %v650_v25  ;;  %v683_v34 = vsel %vm577_vm1, %v3568_v26, 0.0  ;;  %v1429_v17 = vld [vmem:[#allocation7 + $0x50] sm:$0xff] }
 0x165   : > { %603 = vmax.xlane.f32.xlu1 %v602_v18  ;;  %2908 = vpow2.f32 %v654_v39  ;;  %1305 = vmatpush.msra.mxu0 %v1285_v63  ;;  %v1428_v18 = vld [vmem:[#allocation7 + $0x48] sm:$0xff]  ;;  %v1358_v22 = vld [vmem:[#allocation7 + $0x30] sm:$0xff] }
 0x166   : > { %v601_v40 = vpop.xlane.xlu2 %600  ;;  %2722 = vmatmul.msk.f32.vlgmr.msra.gmra.mxu0 %vm328_vm0, %v3430_v3  ;;  %1444 = vmatpush.msra.mxu2 %v1430_v16 }
 0x167   : > { %v633_v43 = vsub.f32 %v3541_v38, %v601_v40  ;;  %v3600_v38 = vmul.f32 0.17677669, %v555_v48  ;;  %1374 = vmatpush.msra.mxu1 %v1358_v22 }
 0x168   : > { %1445 = vmatpush.msra.mxu2 %v1429_v17 }
 0x169   : > { %v3570_v28 = vpop.eup %2904  ;;  %v656_v46 = vmul.f32 1.442695, %v633_v43  ;;  %v620_v53 = vsel %vm577_vm1, %v3600_v38, -inf  ;;  %1375 = vmatpush.msra.mxu1 %v1357_v27 }
 0x16a   : > { %v689_v31 = vsel %vm577_vm1, %v3570_v28, 0.0  ;;  %v3583_v41 = vpop.eup %2906  ;;  %1446 = vmatpush.msra.mxu2 %v1428_v18 }
 0x16b   : > { %v686_v44 = vsel %vm577_vm1, %v3583_v41, 0.0  ;;  %v3594_v47 = vpop.eup %2908  ;;  %2910 = vpow2.f32 %v656_v46  ;;  %1376 = vmatpush.msra.mxu1 %v1356_v23 }
 0x16c   : > { %690 = vadd.xlane.f32.xlu2 %v689_v31  ;;  %606 = vmax.xlane.f32.xlu0 %v605_v29  ;;  %v692_v50 = vsel %vm577_vm1, %v3594_v47, 0.0 }
 0x16d   : > { %684 = vadd.xlane.f32.xlu1 %v683_v34  ;;  %1447 = vmatpush.msra.mxu2 %v1427_v20 }
 0x16e   : > { %2723 = vmatmul.msk.f32.gmra.mxu0 %vm328_vm0, %v3417_v0  ;;  %2754 = vmatmul.msk.f32.vlgmr.msra.gmra.mxu2 %vm328_vm0, %v3430_v3 }
 0x16f   : > { %2738 = vmatmul.msk.f32.vlgmr.msra.gmra.mxu1 %vm328_vm0, %v3430_v3 }
 0x171   : > { %v3602_v52 = vpop.eup %2910 }
 0x172   : > { %v695_v56 = vsel %vm577_vm1, %v3602_v52, 0.0 }
 0x174   : > { %618 = vmax.xlane.f32.xlu2 %v617_v32  ;;  %687 = vadd.xlane.f32.xlu0 %v686_v44 }
 0x175   : > { %612 = vmax.xlane.f32.xlu1 %v611_v42 }
 0x176   : > { %2724 = vmatmul.msk.f32.gmra.mxu0 %vm328_vm0, %v3433_v4  ;;  %2755 = vmatmul.msk.f32.gmra.mxu2 %vm328_vm0, %v3417_v0 }
 0x177   : > { %2739 = vmatmul.msk.f32.gmra.mxu1 %vm328_vm0, %v3417_v0 }
 0x17c   : > { %615 = vmax.xlane.f32.xlu0 %v614_v49 }
 0x17d   : > { %693 = vadd.xlane.f32.xlu1 %v692_v50 }
 0x17e   : > { %2725 = vmatmul.msk.f32.gmra.mxu0 %vm328_vm0, %v3420_v1  ;;  %2756 = vmatmul.msk.f32.gmra.mxu2 %vm328_vm0, %v3433_v4 }
 0x17f   : > { %2740 = vmatmul.msk.f32.gmra.mxu1 %vm328_vm0, %v3433_v4 }
 0x184   : > { %696 = vadd.xlane.f32.xlu0 %v695_v56 }
 0x185   : > { %621 = vmax.xlane.f32.xlu1 %v620_v53 }
 0x186   : > { %2726 = vmatmul.msk.f32.gmra.mxu0 %vm328_vm0, %v3438_v5  ;;  %2757 = vmatmul.msk.f32.gmra.mxu2 %vm328_vm0, %v3420_v1 }
 0x187   : > { %2741 = vmatmul.msk.f32.gmra.mxu1 %vm328_vm0, %v3420_v1  ;;  %v316_v1 = vld [vmem:[%s3402_s5 + $0x20] sm:$0xff] }
 0x18d   : > { %624 = vmax.xlane.f32.xlu1 %v623_v59 }
 0x18e   : > { %2727 = vmatmul.msk.f32.gmra.mxu0 %vm328_vm0, %v3423_v2  ;;  %2758 = vmatmul.msk.f32.gmra.mxu2 %vm328_vm0, %v3438_v5 }
 0x18f   : > { %2742 = vmatmul.msk.f32.gmra.mxu1 %vm328_vm0, %v3438_v5 }
 0x196   : > { %2728 = vmatmul.msk.f32.gmra.mxu0 %vm328_vm0, %v3449_v8  ;;  %2759 = vmatmul.msk.f32.gmra.mxu2 %vm328_vm0, %v3423_v2 }
 0x197   : > { %2743 = vmatmul.msk.f32.gmra.mxu1 %vm328_vm0, %v3423_v2 }
 0x19e   : > { %2729 = vmatmul.msk.f32.gmra.mxu0 %vm328_vm0, %v3441_v6  ;;  %2760 = vmatmul.msk.f32.gmra.mxu2 %vm328_vm0, %v3449_v8 }
 0x19f   : > { %2744 = vmatmul.msk.f32.gmra.mxu1 %vm328_vm0, %v3449_v8 }
 0x1a6   : > { %2730 = vmatmul.msk.f32.gmra.mxu0 %vm328_vm0, %v3483_v10  ;;  %2761 = vmatmul.msk.f32.gmra.mxu2 %vm328_vm0, %v3441_v6 }
 0x1a7   : > { %2745 = vmatmul.msk.f32.gmra.mxu1 %vm328_vm0, %v3441_v6 }
 0x1ae   : > { %2731 = vmatmul.msk.f32.gmra.mxu0 %vm328_vm0, %v3444_v7  ;;  %2762 = vmatmul.msk.f32.gmra.mxu2 %vm328_vm0, %v3483_v10 }
 0x1af   : > { %2746 = vmatmul.msk.f32.gmra.mxu1 %vm328_vm0, %v3483_v10 }
 0x1b6   : > { %2732 = vmatmul.msk.f32.gmra.mxu0 %vm328_vm0, %v3493_v12  ;;  %2763 = vmatmul.msk.f32.gmra.mxu2 %vm328_vm0, %v3444_v7 }
 0x1b7   : > { %2747 = vmatmul.msk.f32.gmra.mxu1 %vm328_vm0, %v3444_v7 }
 0x1be   : > { %2733 = vmatmul.msk.f32.gmra.mxu0 %vm328_vm0, %v3478_v9  ;;  %2764 = vmatmul.msk.f32.gmra.mxu2 %vm328_vm0, %v3493_v12 }
 0x1bf   : > { %2748 = vmatmul.msk.f32.gmra.mxu1 %vm328_vm0, %v3493_v12 }
 0x1c6   : > { %2734 = vmatmul.msk.f32.gmra.mxu0 %vm328_vm0, %v3500_v13  ;;  %2765 = vmatmul.msk.f32.gmra.mxu2 %vm328_vm0, %v3478_v9 }
 0x1c7   : > { %2749 = vmatmul.msk.f32.gmra.mxu1 %vm328_vm0, %v3478_v9  ;;  %v3904_v9 = vld [vmem:[#allocation8] ss:$0 sm:$0xff] }
 0x1ce   : > { %2735 = vmatmul.msk.f32.gmra.mxu0 %vm328_vm0, %v3488_v11  ;;  %2766 = vmatmul.msk.f32.gmra.mxu2 %vm328_vm0, %v3500_v13 }
 0x1cf   : > { %v682_v25 = vpop.xlane.xlu2 %681  ;;  %2750 = vmatmul.msk.f32.gmra.mxu1 %vm328_vm0, %v3500_v13 }
 0x1d0   : > { %2912 = vrcp.f32 %v682_v25  ;;  %v676_v29 = vpop.xlane.xlu1 %675  ;;  %vm755_vm3 = vweird.f32 %v682_v25  ;;  %v761_v44 = vand.u32 2147483648, %v682_v25  ;;  %v759_v54 = vand.u32 2147483647, %v682_v25 }
 0x1d1   : > { %2914 = vrcp.f32 %v676_v29  ;;  %v733_v49 = vand.u32 2147483648, %v676_v29  ;;  %v731_v50 = vand.u32 2147483647, %v676_v29  ;;  %vm727_vm6 = vweird.f32 %v676_v29 }
 0x1d2   : > { %v762_v62 = vor.u32 1.1754944e-38, %v761_v44  ;;  %vm760_vm9 = vcmp.eq.f32.partialorder %v759_v54, 8.507059e+37 }
 0x1d3   : > { %v734_v18 = vor.u32 1.1754944e-38, %v733_v49  ;;  %vm732_vm8 = vcmp.eq.f32.partialorder %v731_v50, 8.507059e+37 }
 0x1d6   : > { %v2913_v30 = vpop.eup %2912  ;;  %2736 = vmatmul.msk.f32.gmra.mxu0 %vm328_vm0, %v3520_v15  ;;  %2767 = vmatmul.msk.f32.gmra.mxu2 %vm328_vm0, %v3488_v11 }
 0x1d7   : > { %v2915_v31 = vpop.eup %2914  ;;  %v751_v33 = vmul.f32 %v2913_v30, %v682_v25  ;;  %v3630_v34 = vpop.xlane.xlu2 %609  ;;  %vm756_vm2 = vweird.f32 %v2913_v30  ;;  %v314_v25 = vld [vmem:[%s3402_s5 + $0x10] sm:$0xff]  ;;  %2751 = vmatmul.msk.f32.gmra.mxu1 %vm328_vm0, %v3488_v11 }
 0x1d8   : > { %v723_v36 = vmul.f32 %v2915_v31, %v676_v29  ;;  %v3632_v39 = vpop.xlane.xlu0 %678  ;;  %v604_v40 = vpop.xlane.xlu1 %603  ;;  %vm3640_vm4 = vmor %vm755_vm3, %vm756_vm2  ;;  %vm728_vm5 = vweird.f32 %v2915_v31  ;;  %v636_v29 = vsub.f32 %v3553_v58, %v3630_v34 }
 0x1d9   : > { %v752_v32 = vsub.f32 1.0, %v751_v33  ;;  %2916 = vrcp.f32 %v3632_v39  ;;  %v634_v3 = vsub.f32 %v3555_v61, %v604_v40  ;;  %vm729_vm7 = vmor %vm727_vm6, %vm728_vm5  ;;  %v747_v23 = vand.u32 2147483648, %v3632_v39 }
 0x1da   : > { %v724_v42 = vsub.f32 1.0, %v723_v36  ;;  %vm741_vm11 = vweird.f32 %v3632_v39 }
 0x1db   : > { %v753_v43 = vmul.f32 %v2913_v30, %v752_v32  ;;  %v658_v48 = vmul.f32 1.442695, %v634_v3 }
 0x1dc   : > { %v725_v46 = vmul.f32 %v2915_v31, %v724_v42  ;;  %v745_v42 = vand.u32 2147483647, %v3632_v39 }
 0x1dd   : > { %v754_v53 = vadd.f32 %v2913_v30, %v753_v43  ;;  %2918 = vpow2.f32 %v658_v48  ;;  %v662_v43 = vmul.f32 1.442695, %v636_v29  ;;  %v748_v48 = vor.u32 1.1754944e-38, %v747_v23 }
 0x1de   : > { %v726_v61 = vadd.f32 %v2915_v31, %v725_v46  ;;  %vm3699_vm12 = vcmp.eq.f32.partialorder %v745_v42, 8.507059e+37  ;;  %2737 = vmatmul.msk.f32.gmra.mxu0 %vm328_vm0, %v3515_v14  ;;  %2768 = vmatmul.msk.f32.gmra.mxu2 %vm328_vm0, %v3520_v15 }
 0x1df   : > { %v3646_v59 = vpop.eup %2916  ;;  %v3648_v0 = vpop.xlane.xlu2 %690  ;;  %v758_v60 = vsel %vm3640_vm4, %v2913_v30, %v754_v53  ;;  %v312_v30 = vld [vmem:[%s3402_s5] sm:$0xff]  ;;  %2752 = vmatmul.msk.f32.gmra.mxu1 %vm328_vm0, %v3520_v15 }
 0x1e0   : > { %v737_v63 = vmul.f32 %v3646_v59, %v3632_v39  ;;  %2920 = vrcp.f32 %v3648_v0  ;;  %v3655_v16 = vpop.xlane.xlu1 %684  ;;  %v607_v17 = vpop.xlane.xlu0 %606  ;;  %v730_v22 = vsel %vm729_vm7, %v2915_v31, %v726_v61  ;;  %v763_v27 = vsel %vm760_vm9, %v762_v62, %v758_v60 }
 0x1e1   : > { %2922 = vrcp.f32 %v3655_v16  ;;  %v635_v21 = vsub.f32 %v3566_v24, %v607_v17  ;;  %v735_v33 = vsel %vm732_vm8, %v734_v18, %v730_v22  ;;  %v948_v36 = vmul.f32 %v3545_v51, %v763_v27 }
 0x1e2   : > { %v738_v20 = vsub.f32 1.0, %v737_v63  ;;  %v946_v31 = vmul.f32 %v3547_v55, %v735_v33  ;;  %vm742_vm10 = vweird.f32 %v3646_v59  ;;  %vm797_vm14 = vweird.f32 %v3648_v0 }
 0x1e3   : > { %v3669_v40 = vpop.eup %2918  ;;  %v660_v24 = vmul.f32 1.442695, %v635_v21  ;;  %v3676_v34 = vmul.f32 %v948_v36, %v314_v25  ;;  %vm3705_vm13 = vmor %vm741_vm11, %vm742_vm10  ;;  %v803_v62 = vand.u32 2147483648, %v3648_v0  ;;  %v775_v17 = vand.u32 2147483648, %v3655_v16  ;;  %v1307_v6 = vpop.f32.mrf.mxu0 }
 0x1e4   : > { %v739_v32 = vmul.f32 %v3646_v59, %v738_v20  ;;  %v698_v58 = vsel %vm577_vm1, %v3669_v40, 0.0  ;;  %v3681_v4 = vmul.f32 %v946_v31, %v312_v30  ;;  %v773_v29 = vand.u32 2147483647, %v3655_v16 }
 0x1e5   : > { %2924 = vpow2.f32 %v660_v24  ;;  %699 = vadd.xlane.f32.xlu0 %v698_v58  ;;  %v984_v46 = vsel %vm577_vm1, %v3676_v34, 0.0  ;;  %v801_v33 = vand.u32 2147483647, %v3648_v0  ;;  %vm769_vm4 = vweird.f32 %v3655_v16 }
 0x1e6   : > { %v3678_v3 = vpop.eup %2920  ;;  %v740_v51 = vadd.f32 %v3646_v59, %v739_v32  ;;  %v978_v50 = vsel %vm577_vm1, %v3681_v4, 0.0  ;;  %985 = vadd.xlane.f32.xlu1 %v984_v46  ;;  %v804_v24 = vor.u32 1.1754944e-38, %v803_v62  ;;  %v776_v31 = vor.u32 1.1754944e-38, %v775_v17  ;;  %2769 = vmatmul.msk.f32.gmra.mxu2 %vm328_vm0, %v3515_v14 }
 0x1e7   : > { %v3686_v55 = vpop.eup %2922  ;;  %v793_v44 = vmul.f32 %v3678_v3, %v3648_v0  ;;  %979 = vadd.xlane.f32.xlu2 %v978_v50  ;;  %vm798_vm15 = vweird.f32 %v3678_v3  ;;  %vm774_vm6 = vcmp.eq.f32.partialorder %v773_v29, 8.507059e+37  ;;  %vm802_vm7 = vcmp.eq.f32.partialorder %v801_v33, 8.507059e+37  ;;  %2753 = vmatmul.msk.f32.gmra.mxu1 %vm328_vm0, %v3515_v14 }
 0x1e8   : > { %v765_v49 = vmul.f32 %v3686_v55, %v3655_v16  ;;  %v613_v53 = vpop.xlane.xlu1 %612  ;;  %v3697_v54 = vpop.xlane.xlu0 %687  ;;  %v744_v18 = vsel %vm3705_vm13, %v3646_v59, %v740_v51  ;;  %vm770_vm2 = vweird.f32 %v3686_v55  ;;  %vm3740_vm3 = vmor %vm797_vm14, %vm798_vm15  ;;  %v1308_v13 = vadd.f32 %v3904_v9, %v1307_v6 }
 0x1e9   : > { %v794_v61 = vsub.f32 1.0, %v793_v44  ;;  %v637_v60 = vsub.f32 %v3581_v37, %v613_v53  ;;  %2926 = vrcp.f32 %v3697_v54  ;;  %v313_v37 = vld [vmem:[%s3402_s5 + $0x8] sm:$0xff]  ;;  %v749_v22 = vsel %vm3699_vm12, %v748_v48, %v744_v18  ;;  %vm3752_vm5 = vmor %vm769_vm4, %vm770_vm2  ;;  %v315_v48 = vld [vmem:[%s3402_s5 + $0x18] sm:$0xff] }
 0x1ea   : > { %v766_v63 = vsub.f32 1.0, %v765_v49  ;;  %v947_v59 = vmul.f32 %v3561_v19, %v749_v22  ;;  %v789_v39 = vand.u32 2147483648, %v3697_v54  ;;  %v317_v18 = vld [vmem:[%s3402_s5 + $0x28] sm:$0xff]  ;;  %vm783_vm9 = vweird.f32 %v3697_v54 }
 0x1eb   : > { %v795_v20 = vmul.f32 %v3678_v3, %v794_v61  ;;  %v664_v21 = vmul.f32 1.442695, %v637_v60  ;;  %v3726_v25 = vpop.eup %2924  ;;  %v619_v61 = vpop.xlane.xlu2 %618 }
 0x1ec   : > { %v767_v27 = vmul.f32 %v3686_v55, %v766_v63  ;;  %v701_v23 = vsel %vm577_vm1, %v3726_v25, 0.0  ;;  %v3745_v19 = vmul.f32 %v947_v59, %v313_v37  ;;  %v1310_v7 = vpop.f32.mrf.mxu0 }
 0x1ed   : > { %2928 = vpow2.f32 %v664_v21  ;;  %v796_v30 = vadd.f32 %v3678_v3, %v795_v20  ;;  %702 = vadd.xlane.f32.xlu0 %v701_v23  ;;  %v787_v20 = vand.u32 2147483647, %v3697_v54  ;;  %v639_v21 = vsub.f32 %v3579_v35, %v619_v61 }
 0x1ee   : > { %2930 = vpow2.f32 %v662_v43  ;;  %v768_v36 = vadd.f32 %v3686_v55, %v767_v27  ;;  %v981_v58 = vsel %vm577_vm1, %v3745_v19, 0.0 }
 0x1ef   : > { %v2927_v32 = vpop.eup %2926  ;;  %v800_v16 = vsel %vm3740_vm3, %v3678_v3, %v796_v30  ;;  %982 = vadd.xlane.f32.xlu2 %v981_v58  ;;  %vm788_vm11 = vcmp.eq.f32.partialorder %v787_v20, 8.507059e+37 }
 0x1f0   : > { %v779_v42 = vmul.f32 %v2927_v32, %v3697_v54  ;;  %v3762_v51 = vpop.xlane.xlu1 %693  ;;  %v616_v43 = vpop.xlane.xlu0 %615  ;;  %v772_v44 = vsel %vm3752_vm5, %v3686_v55, %v768_v36  ;;  %v805_v50 = vsel %vm802_vm7, %v804_v24, %v800_v16  ;;  %vm784_vm8 = vweird.f32 %v2927_v32 }
 0x1f1   : > { %2932 = vrcp.f32 %v3762_v51  ;;  %v638_v46 = vsub.f32 %v3592_v45, %v616_v43  ;;  %v777_v49 = vsel %vm774_vm6, %v776_v31, %v772_v44  ;;  %v951_v63 = vmul.f32 %v3570_v28, %v805_v50  ;;  %vm3791_vm10 = vmor %vm783_vm9, %vm784_vm8  ;;  %v1449_v12 = vpop.f32.mrf.mxu2 }
 0x1f2   : > { %v780_v3 = vsub.f32 1.0, %v779_v42  ;;  %v949_v56 = vmul.f32 %v3568_v26, %v777_v49  ;;  %v790_v54 = vor.u32 1.1754944e-38, %v789_v39  ;;  %v668_v24 = vmul.f32 1.442695, %v639_v21  ;;  %v318_v39 = vld [vmem:[%s3402_s5 + $0x30] sm:$0xff] }
 0x1f3   : > { %v3772_v53 = vpop.eup %2928  ;;  %v666_v55 = vmul.f32 1.442695, %v638_v46  ;;  %v3802_v23 = vmul.f32 %v951_v63, %v317_v18  ;;  %v817_v0 = vand.u32 2147483648, %v3762_v51  ;;  %v815_v58 = vand.u32 2147483647, %v3762_v51 }
 0x1f4   : > { %v3778_v45 = vpop.eup %2930  ;;  %v781_v60 = vmul.f32 %v2927_v32, %v780_v3  ;;  %v707_v62 = vsel %vm577_vm1, %v3772_v53, 0.0  ;;  %v3783_v17 = vmul.f32 %v949_v56, %v315_v48  ;;  %vm811_vm13 = vweird.f32 %v3762_v51  ;;  %v1313_v10 = vpop.f32.mrf.mxu0 }
 0x1f5   : > { %708 = vadd.xlane.f32.xlu1 %v707_v62  ;;  %2934 = vpow2.f32 %v666_v55  ;;  %v704_v28 = vsel %vm577_vm1, %v3778_v45, 0.0  ;;  %v993_v42 = vsel %vm577_vm1, %v3802_v23, 0.0  ;;  %v818_v44 = vor.u32 1.1754944e-38, %v817_v0 }
 0x1f6   : > { %v782_v5 = vadd.f32 %v2927_v32, %v781_v60  ;;  %v987_v22 = vsel %vm577_vm1, %v3783_v17, 0.0  ;;  %vm816_vm15 = vcmp.eq.f32.partialorder %v815_v58, 8.507059e+37  ;;  %v1497_v58 = vlaneseq }
 0x1f7   : > { %v2933_v26 = vpop.eup %2932  ;;  %988 = vadd.xlane.f32.xlu0 %v987_v22  ;;  %705 = vadd.xlane.f32.xlu2 %v704_v28  ;;  %v319_v22 = vld [vmem:[%s3402_s5 + $0x38] sm:$0xff] }
 0x1f8   : > { %v807_v27 = vmul.f32 %v2933_v26, %v3762_v51  ;;  %v622_v59 = vpop.xlane.xlu1 %621  ;;  %v3800_v29 = vpop.xlane.xlu0 %696  ;;  %v786_v35 = vsel %vm3791_vm10, %v2927_v32, %v782_v5  ;;  %vm812_vm12 = vweird.f32 %v2933_v26 }
 0x1f9   : > { %v640_v30 = vsub.f32 %v3600_v38, %v622_v59  ;;  %2936 = vrcp.f32 %v3800_v29  ;;  %v791_v36 = vsel %vm788_vm11, %v790_v54, %v786_v35  ;;  %vm813_vm14 = vmor %vm811_vm13, %vm812_vm12  ;;  %v831_v62 = vand.u32 2147483648, %v3800_v29 }
 0x1fa   : > { %v808_v33 = vsub.f32 1.0, %v807_v27  ;;  %v950_v31 = vmul.f32 %v3583_v41, %v791_v36  ;;  %v829_v18 = vand.u32 2147483647, %v3800_v29  ;;  %vm825_vm3 = vweird.f32 %v3800_v29 }
 0x1fb   : > { %v670_v16 = vmul.f32 1.442695, %v640_v30  ;;  %v3815_v32 = vpop.eup %2934  ;;  %v832_v8 = vor.u32 1.1754944e-38, %v831_v62  ;;  %v1314_v36 = vadd.f32 %v3904_v9, %v1313_v10 }
 0x1fc   : > { %v809_v38 = vmul.f32 %v2933_v26, %v808_v33  ;;  %v3820_v43 = vmul.f32 %v950_v31, %v316_v1  ;;  %v710_v3 = vsel %vm577_vm1, %v3815_v32, 0.0  ;;  %vm830_vm5 = vcmp.eq.f32.partialorder %v829_v18, 8.507059e+37  ;;  %v3910_v33 = vld [vmem:[#allocation8 + $0x2] ss:$0 sm:$0xff]  ;;  %v1316_v11 = vpop.f32.mrf.mxu0  ;;  %v1452_v1 = vpop.f32.mrf.mxu2 }
 0x1fd   : > { %2938 = vpow2.f32 %v670_v16  ;;  %994 = vadd.xlane.f32.xlu1 %v993_v42  ;;  %v1450_v15 = vadd.f32 %v3910_v33, %v1449_v12  ;;  %v1453_v0 = vadd.f32 %v3910_v33, %v1452_v1 }
 0x1fe   : > { %v810_v41 = vadd.f32 %v2933_v26, %v809_v38  ;;  %2940 = vpow2.f32 %v668_v24  ;;  %v990_v46 = vsel %vm577_vm1, %v3820_v43, 0.0  ;;  %v1317_v24 = vadd.f32 %v3904_v9, %v1316_v11 }
 0x1ff   : > { %v2937_v2 = vpop.eup %2936  ;;  %711 = vadd.xlane.f32.xlu0 %v710_v3  ;;  %991 = vadd.xlane.f32.xlu2 %v990_v46 }
 0x200   : > { %v821_v48 = vmul.f32 %v2937_v2, %v3800_v29  ;;  %v625_v49 = vpop.xlane.xlu1 %624  ;;  %v814_v51 = vsel %vm813_vm14, %v2933_v26, %v810_v41  ;;  %vm826_vm2 = vweird.f32 %v2937_v2  ;;  %1636 = vmatpush.msra.mxu3 %v1453_v0  ;;  %1897 = vmatpush.msrb.mxu1 %v1317_v24 }
 0x201   : > { %v641_v50 = vsub.f32 %v3608_v57, %v625_v49  ;;  %v819_v55 = vsel %vm816_vm15, %v818_v44, %v814_v51  ;;  %vm827_vm4 = vmor %vm825_vm3, %vm826_vm2  ;;  %v3925_v49 = vshrl.u32 %v1497_v58, 7  ;;  %v3927_v51 = vand.u32 127, %v1497_v58 }
 0x202   : > { %v822_v56 = vsub.f32 1.0, %v821_v48  ;;  %v952_v61 = vmul.f32 %v3594_v47, %v819_v55  ;;  %1637 = vmatpush.msra.mxu3 %v1450_v15  ;;  %1898 = vmatpush.msrb.mxu1 %v1314_v36 }
 0x203   : > { %v3835_v60 = vpop.eup %2938  ;;  %v672_v63 = vmul.f32 1.442695, %v641_v50  ;;  %vm3953_vm11 = vcmp.lt.s32.totalorder %v3927_v51, %v3925_v49  ;;  %vm3959_vm12 = vcmp.gt.s32.totalorder %v3927_v51, %v3925_v49 }
 0x204   : > { %v823_v20 = vmul.f32 %v2937_v2, %v822_v56  ;;  %v716_v57 = vsel %vm577_vm1, %v3835_v60, 0.0  ;;  %v3843_v5 = vmul.f32 %v952_v61, %v318_v39  ;;  %v3845_v26 = vpop.eup %2940  ;;  %v3933_v62 = vpop.f32.mrf.mxu2 }
 0x205   : > { %717 = vadd.xlane.f32.xlu1 %v716_v57  ;;  %2942 = vpow2.f32 %v672_v63  ;;  %v713_v37 = vsel %vm577_vm1, %v3845_v26, 0.0 }
 0x206   : > { %v996_v47 = vsel %vm577_vm1, %v3843_v5, 0.0  ;;  %v824_v21 = vadd.f32 %v2937_v2, %v823_v20 }
 0x207   : > { %997 = vadd.xlane.f32.xlu0 %v996_v47  ;;  %714 = vadd.xlane.f32.xlu2 %v713_v37 }
 0x208   : > { %v828_v28 = vsel %vm827_vm4, %v2937_v2, %v824_v21 }
 0x209   : > { %v833_v54 = vsel %vm830_vm5, %v832_v8, %v828_v28 }
 0x20a   : > { %v953_v27 = vmul.f32 %v3602_v52, %v833_v54  ;;  %v1311_v52 = vadd.f32 %v3904_v9, %v1310_v7 }
 0x20b   : > { %v3860_v59 = vpop.eup %2942 }
 0x20c   : > { %v3862_v29 = vmul.f32 %v953_v27, %v319_v22  ;;  %v719_v30 = vsel %vm577_vm1, %v3860_v59, 0.0  ;;  %1868 = vmatpush.msrb.mxu0 %v1311_v52 }
 0x20e   : > { %5170 = vst [vmem:[#allocation16_spill] sm:$0xff] %v3862_v29  ;;  %v999_v35 = vsel %vm577_vm1, %v3862_v29, 0.0  ;;  %1869 = vmatpush.msrb.mxu0 %v1308_v13 }
 0x20f   : > { %720 = vadd.xlane.f32.xlu0 %v719_v30  ;;  %1000 = vadd.xlane.f32.xlu2 %v999_v35 }
 0x258   : > { %v700_v14 = vpop.xlane.xlu0 %699 }
 0x259   : > { %2944 = vrcp.f32 %v700_v14  ;;  %v986_v16 = vpop.xlane.xlu1 %985  ;;  %v845_v2 = vand.u32 2147483648, %v700_v14  ;;  %v843_v3 = vand.u32 2147483647, %v700_v14  ;;  %vm839_vm6 = vweird.f32 %v700_v14 }
 0x25a   : > { %v980_v31 = vpop.xlane.xlu2 %979  ;;  %v3916_v38 = vadd.f32 1e-10, %v986_v16 }
 0x25b   : > { %v3918_v42 = vadd.f32 1e-10, %v980_v31  ;;  %v846_v39 = vor.u32 1.1754944e-38, %v845_v2  ;;  %vm3942_vm9 = vcmp.eq.f32.partialorder %v843_v3, 8.507059e+37 }
 0x25c   : > { %2946 = vrcp.f32 %v3916_v38  ;;  %v1079_v55 = vand.u32 2147483647, %v3916_v38  ;;  %v1081_v56 = vand.u32 2147483648, %v3916_v38  ;;  %vm1075_vm8 = vweird.f32 %v3916_v38 }
 0x25d   : > { %2948 = vrcp.f32 %v3918_v42  ;;  %v1053_v20 = vand.u32 2147483648, %v3918_v42  ;;  %vm1047_vm10 = vweird.f32 %v3918_v42  ;;  %v1051_v27 = vand.u32 2147483647, %v3918_v42 }
 0x25e   : > { %v1082_v35 = vor.u32 1.1754944e-38, %v1081_v56  ;;  %vm3963_vm13 = vcmp.eq.f32.partialorder %v1079_v55, 8.507059e+37  ;;  %v4003_v56 = vpop.f32.mrf.mxu2 }
 0x25f   : > { %v2945_v41 = vpop.eup %2944  ;;  %v1054_v12 = vor.u32 1.1754944e-38, %v1053_v20  ;;  %vm1052_vm5 = vcmp.eq.f32.partialorder %v1051_v27, 8.507059e+37 }
 0x260   : > { %v835_v44 = vmul.f32 %v2945_v41, %v700_v14  ;;  %v3922_v46 = vpop.xlane.xlu0 %702  ;;  %vm840_vm7 = vweird.f32 %v2945_v41  ;;  %v320_v14 = vld [vmem:[%s3402_s5 + $0x40] sm:$0xff] }
 0x261   : > { %2950 = vrcp.f32 %v3922_v46  ;;  %vm841_vm14 = vmor %vm839_vm6, %vm840_vm7  ;;  %v859_v11 = vand.u32 2147483648, %v3922_v46  ;;  %v857_v3 = vand.u32 2147483647, %v3922_v46  ;;  %vm853_vm7 = vweird.f32 %v3922_v46 }
 0x262   : > { %v836_v48 = vsub.f32 1.0, %v835_v44  ;;  %v3929_v50 = vpop.eup %2946  ;;  %v983_v61 = vpop.xlane.xlu2 %982 }
 0x263   : > { %v2949_v63 = vpop.eup %2948  ;;  %v1071_v57 = vmul.f32 %v3929_v50, %v3916_v38  ;;  %v3938_v47 = vadd.f32 1e-10, %v983_v61  ;;  %vm1076_vm2 = vweird.f32 %v3929_v50  ;;  %v860_v20 = vor.u32 1.1754944e-38, %v859_v11 }
 0x264   : > { %v837_v18 = vmul.f32 %v2945_v41, %v836_v48  ;;  %v1043_v21 = vmul.f32 %v2949_v63, %v3918_v42  ;;  %vm1048_vm15 = vweird.f32 %v2949_v63  ;;  %vm3994_vm6 = vmor %vm1075_vm8, %vm1076_vm2 }
 0x265   : > { %v1072_v37 = vsub.f32 1.0, %v1071_v57  ;;  %2952 = vrcp.f32 %v3938_v47  ;;  %vm1049_vm3 = vmor %vm1047_vm10, %vm1048_vm15  ;;  %vm1061_vm10 = vweird.f32 %v3938_v47 }
 0x266   : > { %v838_v28 = vadd.f32 %v2945_v41, %v837_v18  ;;  %v1044_v54 = vsub.f32 1.0, %v1043_v21 }
 0x267   : > { %v2951_v22 = vpop.eup %2950  ;;  %v1073_v13 = vmul.f32 %v3929_v50, %v1072_v37 }
 0x268   : > { %v3949_v30 = vpop.xlane.xlu1 %708  ;;  %v849_v52 = vmul.f32 %v2951_v22, %v3922_v46  ;;  %v1045_v1 = vmul.f32 %v2949_v63, %v1044_v54  ;;  %v842_v36 = vsel %vm841_vm14, %v2945_v41, %v838_v28  ;;  %vm854_vm4 = vweird.f32 %v2951_v22 }
 0x269   : > { %v1074_v15 = vadd.f32 %v3929_v50, %v1073_v13  ;;  %2954 = vrcp.f32 %v3949_v30  ;;  %v847_v16 = vsel %vm3942_vm9, %v846_v39, %v842_v36  ;;  %vm855_vm8 = vmor %vm853_vm7, %vm854_vm4  ;;  %vm858_vm9 = vcmp.eq.f32.partialorder %v857_v3, 8.507059e+37  ;;  %v4062_v3 = vpop.f32.mrf.mxu0 }
 0x26a   : > { %v850_v24 = vsub.f32 1.0, %v849_v52  ;;  %v989_v0 = vpop.xlane.xlu0 %988  ;;  %v1046_v31 = vadd.f32 %v2949_v63, %v1045_v1  ;;  %v3978_v58 = vpop.xlane.xlu2 %705  ;;  %v954_v44 = vmul.f32 %v3669_v40, %v847_v16  ;;  %v1067_v39 = vand.u32 2147483648, %v3938_v47 }
 0x26b   : > { %v3980_v2 = vadd.f32 1e-10, %v989_v0  ;;  %v3984_v41 = vpop.eup %2952  ;;  %2956 = vrcp.f32 %v3978_v58  ;;  %v1078_v38 = vsel %vm3994_vm6, %v3929_v50, %v1074_v15  ;;  %v4047_v15 = vadd.s32 8, %v3925_v49 }
 0x26c   : > { %v851_v48 = vmul.f32 %v2951_v22, %v850_v24  ;;  %v1057_v40 = vmul.f32 %v3984_v41, %v3938_v47  ;;  %v4001_v42 = vmul.f32 %v954_v44, %v320_v14  ;;  %v1050_v55 = vsel %vm1049_vm3, %v2949_v63, %v1046_v31 }
 0x26d   : > { %2958 = vrcp.f32 %v3980_v2  ;;  %v1055_v61 = vsel %vm1052_vm5, %v1054_v12, %v1050_v55  ;;  %v1083_v50 = vsel %vm3963_vm13, %v1082_v35, %v1078_v38  ;;  %v321_v35 = vld [vmem:[%s3402_s5 + $0x48] sm:$0xff]  ;;  %v1065_v14 = vand.u32 2147483647, %v3938_v47 }
 0x26e   : > { %5181 = vst [vmem:[#allocation17_spill] sm:$0xff] %v4001_v42  ;;  %v852_v18 = vadd.f32 %v2951_v22, %v851_v48  ;;  %v1058_v57 = vsub.f32 1.0, %v1057_v40  ;;  %v1002_v21 = vsel %vm577_vm1, %v4001_v42, 0.0  ;;  %v4016_v46 = vmul.f32 %v1055_v61, %v3681_v4 }
 0x26f   : > { %v4011_v63 = vpop.eup %2954  ;;  %1003 = vadd.xlane.f32.xlu1 %v1002_v21  ;;  %v4021_v54 = vmul.f32 %v1083_v50, %v3676_v34  ;;  %v873_v16 = vand.u32 2147483648, %v3978_v58  ;;  %v1456_v31 = vadd.f32 %v3910_v33, %v3933_v62  ;;  %vm4076_vm13 = vcmp.lt.s32.totalorder %v3927_v51, %v4047_v15 }
 0x270   : > { %v995_v8 = vpop.xlane.xlu1 %994  ;;  %v856_v28 = vsel %vm855_vm8, %v2951_v22, %v852_v18  ;;  %v1530_v13 = vsel %vm3953_vm11, %v4016_v46, 0.0  ;;  %v1508_v4 = vsel %vm3959_vm12, %v4016_v46, 0.0  ;;  %v1059_v10 = vmul.f32 %v3984_v41, %v1058_v57  ;;  %v4080_v18 = vpop.f32.mrf.mxu2 }
 0x271   : > { %v4013_v37 = vadd.f32 1e-10, %v995_v8  ;;  %5182 = vst [vmem:[#allocation18_spill] sm:$0xff] %v4021_v54  ;;  %v861_v27 = vsel %vm858_vm9, %v860_v20, %v856_v28  ;;  %v4023_v12 = vpop.eup %2956  ;;  %v877_v11 = vmul.f32 %v4011_v63, %v3949_v30  ;;  %2770 = vmatmul.msk.f32.vlgmr.msra.gmra.mxu3 %vm577_vm1, %v1530_v13  ;;  %2786 = vmatmul.msk.f32.vlgmr.msrb.gmra.mxu0 %vm577_vm1, %v1508_v4  ;;  %v1510_v1 = vsel %vm3959_vm12, %v4021_v54, 0.0 }
 0x272   : > { %v4032_v52 = vpop.xlane.xlu0 %711  ;;  %v955_v22 = vmul.f32 %v3726_v25, %v861_v27  ;;  %v992_v36 = vpop.xlane.xlu2 %991  ;;  %v887_v25 = vand.u32 2147483648, %v3949_v30  ;;  %v863_v24 = vmul.f32 %v4023_v12, %v3978_v58  ;;  %2788 = vmatmul.msk.f32.vlgmr.msrb.gmra.mxu1 %vm577_vm1, %v1510_v1  ;;  %v1060_v62 = vadd.f32 %v3984_v41, %v1059_v10 }
 0x273   : > { %2960 = vrcp.f32 %v4013_v37  ;;  %v4036_v34 = vpop.eup %2958  ;;  %v4053_v0 = vadd.f32 1e-10, %v992_v36  ;;  %v878_v40 = vsub.f32 1.0, %v877_v11  ;;  %vm881_vm14 = vweird.f32 %v3949_v30 }
 0x274   : > { %2962 = vrcp.f32 %v4032_v52  ;;  %v4060_v44 = vmul.f32 %v955_v22, %v321_v35  ;;  %v1085_v48 = vmul.f32 %v4036_v34, %v3980_v2  ;;  %v4085_v57 = vor.u32 1.1754944e-38, %v887_v25 }
 0x275   : > { %2964 = vrcp.f32 %v4053_v0  ;;  %v864_v21 = vsub.f32 1.0, %v863_v24  ;;  %vm4088_vm15 = vcmp.eq.f32.partialorder %v1065_v14, 8.507059e+37  ;;  %v4092_v50 = vor.u32 1.1754944e-38, %v873_v16 }
 0x276   : > { %5183 = vst [vmem:[#allocation19_spill] sm:$0xff] %v4060_v44  ;;  %v1005_v55 = vsel %vm577_vm1, %v4060_v44, 0.0  ;;  %v901_v27 = vand.u32 2147483648, %v4032_v52  ;;  %vm1062_vm2 = vweird.f32 %v3984_v41  ;;  %vm867_vm3 = vweird.f32 %v3978_v58 }
 0x277   : > { %1006 = vadd.xlane.f32.xlu2 %v1005_v55  ;;  %v1086_v13 = vsub.f32 1.0, %v1085_v48  ;;  %v1109_v4 = vand.u32 2147483648, %v4053_v0  ;;  %vm1063_vm4 = vmor %vm1061_vm10, %vm1062_vm2  ;;  %v1068_v35 = vor.u32 1.1754944e-38, %v1067_v39  ;;  %v1459_v22 = vadd.f32 %v3910_v33, %v4003_v56 }
 0x278   : > { %v4071_v61 = vpop.xlane.xlu1 %717  ;;  %v879_v11 = vmul.f32 %v4011_v63, %v878_v40  ;;  %vm882_vm5 = vweird.f32 %v4011_v63  ;;  %v1064_v36 = vsel %vm1063_vm4, %v3984_v41, %v1060_v62  ;;  %v865_v47 = vmul.f32 %v4023_v12, %v864_v21  ;;  %v4176_v56 = vpop.f32.mrf.mxu2 }
 0x279   : > { %v4082_v20 = vpop.eup %2960  ;;  %2966 = vrcp.f32 %v4071_v61  ;;  %v929_v1 = vand.u32 2147483648, %v4071_v61  ;;  %vm868_vm6 = vweird.f32 %v4023_v12  ;;  %v1069_v14 = vsel %vm4088_vm15, %v1068_v35, %v1064_v36  ;;  %1665 = vmatpush.msrb.mxu3 %v1459_v22  ;;  %v4144_v36 = vpop.f32.mrf.mxu0  ;;  %vm4161_vm8 = vmor %vm881_vm14, %vm882_vm5 }
 0x27a   : > { %v1113_v28 = vmul.f32 %v4082_v20, %v4013_v37  ;;  %v4104_v10 = vpop.eup %2962  ;;  %v4110_v25 = vpop.xlane.xlu2 %714  ;;  %v4121_v41 = vor.u32 1.1754944e-38, %v901_v27  ;;  %vm4125_vm7 = vcmp.gt.s32.totalorder %v3927_v51, %v4047_v15  ;;  %v1087_v62 = vmul.f32 %v4036_v34, %v1086_v13  ;;  %vm4189_vm14 = vmor %vm867_vm3, %vm868_vm6 }
 0x27b   : > { %v4112_v24 = vpop.eup %2964  ;;  %v998_v16 = vpop.xlane.xlu0 %997  ;;  %v4132_v21 = vor.u32 1.1754944e-38, %v1109_v4  ;;  %v4135_v8 = vmul.f32 %v1069_v14, %v3745_v19  ;;  %2968 = vrcp.f32 %v4110_v25  ;;  %1666 = vmatpush.msrb.mxu3 %v1456_v31  ;;  %v891_v27 = vmul.f32 %v4104_v10, %v4032_v52 }
 0x27c   : > { %v1114_v48 = vsub.f32 1.0, %v1113_v28  ;;  %v1099_v39 = vmul.f32 %v4112_v24, %v4053_v0  ;;  %v4140_v35 = vor.u32 1.1754944e-38, %v929_v1  ;;  %v4142_v22 = vadd.f32 1e-10, %v998_v16  ;;  %v322_v1 = vld [vmem:[%s3402_s5 + $0x50] sm:$0xff] }
 0x27d   : > { %v1531_v19 = vsel %vm4076_vm13, %v4135_v8, 0.0  ;;  %v1509_v31 = vsel %vm4125_vm7, %v4135_v8, 0.0  ;;  %v880_v4 = vadd.f32 %v4011_v63, %v879_v11  ;;  %v915_v16 = vand.u32 2147483648, %v4110_v25 }
 0x27e   : > { %v1100_v28 = vsub.f32 1.0, %v1099_v39  ;;  %v4166_v14 = vmul.f32 %v4082_v20, %v1114_v48  ;;  %2771 = vmatmul.msk.f32.gmra.mxu3 %vm577_vm1, %v1531_v19  ;;  %2787 = vmatmul.msk.f32.gmra.mxu0 %vm577_vm1, %v1509_v31  ;;  %v4173_v11 = vadd.f32 %v3904_v9, %v4062_v3  ;;  %v885_v39 = vand.u32 2147483647, %v3949_v30 }
 0x27f   : > { %v4129_v55 = vpop.eup %2966  ;;  %vm1103_vm9 = vweird.f32 %v4053_v0  ;;  %vm1104_vm10 = vweird.f32 %v4112_v24  ;;  %v884_v48 = vsel %vm4161_vm8, %v4011_v63, %v880_v4  ;;  %v866_v19 = vadd.f32 %v4023_v12, %v865_v47 }
 0x280   : > { %v4148_v13 = vmul.f32 %v4129_v55, %v4071_v61  ;;  %v871_v31 = vand.u32 2147483647, %v3978_v58  ;;  %v1101_v3 = vmul.f32 %v4112_v24, %v1100_v28  ;;  %v892_v44 = vsub.f32 1.0, %v891_v27  ;;  %v323_v28 = vld [vmem:[%s3402_s5 + $0x58] sm:$0xff] }
 0x281   : > { %vm896_vm15 = vweird.f32 %v4104_v10  ;;  %2970 = vrcp.f32 %v4142_v22  ;;  %v1088_v63 = vadd.f32 %v4036_v34, %v1087_v62  ;;  %v4197_v47 = vpop.eup %2968  ;;  %vm886_vm2 = vcmp.eq.f32.partialorder %v885_v39, 8.507059e+37 }
 0x282   : > { %v920_v4 = vsub.f32 1.0, %v4148_v13  ;;  %v870_v58 = vsel %vm4189_vm14, %v4023_v12, %v866_v19  ;;  %vm872_vm3 = vcmp.eq.f32.partialorder %v871_v31, 8.507059e+37  ;;  %vm895_vm4 = vweird.f32 %v4032_v52  ;;  %v1001_v62 = vpop.xlane.xlu2 %1000  ;;  %v4230_v31 = vpop.f32.mrf.mxu0 }
 0x283   : > { %v889_v27 = vsel %vm886_vm2, %v4085_v57, %v884_v48  ;;  %v875_v42 = vsel %vm872_vm3, %v4092_v50, %v870_v58  ;;  %vm1089_vm5 = vweird.f32 %v3980_v2  ;;  %vm1090_vm6 = vweird.f32 %v4036_v34  ;;  %v4266_v12 = vpop.f32.mrf.mxu2 }
 0x284   : > { %v957_v13 = vmul.f32 %v3772_v53, %v889_v27  ;;  %v956_v39 = vmul.f32 %v3778_v45, %v875_v42  ;;  %vm4212_vm8 = vmor %vm1089_vm5, %vm1090_vm6  ;;  %v1093_v19 = vand.u32 2147483647, %v3980_v2  ;;  %v1095_v57 = vand.u32 2147483648, %v3980_v2  ;;  %v4228_v42 = vpop.xlane.xlu0 %720 }
 0x285   : > { %v1102_v48 = vadd.f32 %v4112_v24, %v1101_v3  ;;  %vm923_vm14 = vweird.f32 %v4071_v61  ;;  %v905_v50 = vmul.f32 %v4197_v47, %v4110_v25  ;;  %v1532_v53 = vsel %vm3953_vm11, %v4021_v54, 0.0  ;;  %vm4256_vm5 = vmor %vm1103_vm9, %vm1104_vm10 }
 0x286   : > { %v1092_v45 = vsel %vm4212_vm8, %v4036_v34, %v1088_v63  ;;  %v4232_v2 = vmul.f32 %v957_v13, %v323_v28  ;;  %v4234_v30 = vmul.f32 %v956_v39, %v322_v1  ;;  %v1096_v3 = vor.u32 1.1754944e-38, %v1095_v57  ;;  %2772 = vmatmul.msk.f32.vlgmr.msrb.gmra.mxu3 %vm577_vm1, %v1532_v53  ;;  %v4245_v34 = vpop.f32.mrf.mxu1  ;;  %vm4289_vm8 = vmor %vm895_vm4, %vm896_vm15 }
 0x287   : > { %v4236_v58 = vadd.f32 1e-10, %v1001_v62  ;;  %v4238_v27 = vpop.eup %2970  ;;  %v893_v29 = vmul.f32 %v4104_v10, %v892_v44  ;;  %vm924_vm2 = vweird.f32 %v4129_v55  ;;  %v4242_v54 = vor.u32 1.1754944e-38, %v915_v16 }
 0x288   : > { %vm1094_vm3 = vcmp.eq.f32.partialorder %v1093_v19, 8.507059e+37  ;;  %v1011_v63 = vsel %vm577_vm1, %v4232_v2, 0.0  ;;  %v1008_v28 = vsel %vm577_vm1, %v4234_v30, 0.0  ;;  %2972 = vrcp.f32 %v4228_v42  ;;  %vm4317_vm15 = vmor %vm923_vm14, %vm924_vm2 }
 0x289   : > { %v1097_v1 = vsel %vm1094_vm3, %v1096_v3, %v1092_v45  ;;  %v921_v16 = vmul.f32 %v4129_v55, %v920_v4  ;;  %v906_v62 = vsub.f32 1.0, %v905_v50  ;;  %1012 = vadd.xlane.f32.xlu1 %v1011_v63  ;;  %1009 = vadd.xlane.f32.xlu0 %v1008_v28  ;;  %v1323_v39 = vadd.f32 %v3904_v9, %v4144_v36 }
 0x28a   : > { %v4262_v13 = vmul.f32 %v1097_v1, %v3783_v17  ;;  %vm910_vm6 = vweird.f32 %v4197_v47  ;;  %2974 = vrcp.f32 %v4236_v58  ;;  %v1106_v19 = vsel %vm4256_vm5, %v4112_v24, %v1102_v48  ;;  %v324_v1 = vld [vmem:[%s3402_s5 + $0x60] sm:$0xff] }
 0x28b   : > { %v5198_v4 = vand.u32 2147483647, %v4053_v0  ;;  %vm909_vm10 = vweird.f32 %v4110_v25  ;;  %v4278_v17 = vmul.f32 %v4238_v27, %v4142_v22  ;;  %1926 = vmatpush.msrb.mxu2 %v1323_v39  ;;  %v894_v50 = vadd.f32 %v4104_v10, %v893_v29 }
 0x28c   : > { %v1511_v36 = vsel %vm4125_vm7, %v4262_v13, 0.0  ;;  %v1462_v24 = vadd.f32 %v3910_v33, %v4080_v18  ;;  %v1465_v29 = vadd.f32 %v3910_v33, %v4176_v56  ;;  %v907_v53 = vmul.f32 %v4197_v47, %v906_v62 }
 0x28d   : > { %vm1108_vm9 = vcmp.eq.f32.partialorder %v5198_v4, 8.507059e+37  ;;  %2789 = vmatmul.msk.f32.gmra.mxu1 %vm577_vm1, %v1511_v36  ;;  %1927 = vmatpush.msrb.mxu2 %v4173_v11  ;;  %v898_v45 = vsel %vm4289_vm8, %v4104_v10, %v894_v50  ;;  %v922_v3 = vadd.f32 %v4129_v55, %v921_v16  ;;  %v927_v18 = vand.u32 2147483647, %v4071_v61  ;;  %vm4369_vm8 = vmor %vm909_vm10, %vm910_vm6 }
 0x28e   : > { %v1111_v57 = vsel %vm1108_vm9, %v4132_v21, %v1106_v19  ;;  %v899_v21 = vand.u32 2147483647, %v4032_v52  ;;  %v4311_v63 = vpop.eup %2972  ;;  %v1533_v10 = vsel %vm4076_vm13, %v4262_v13, 0.0  ;;  %1694 = vmatpush.msra.mxu3 %v1465_v29  ;;  %v1116_v11 = vadd.f32 %v4082_v20, %v4166_v14  ;;  %v326_v19 = vld [vmem:[%s3402_s5 + $0x70] sm:$0xff]  ;;  %v4352_v36 = vpop.f32.mrf.mxu1 }
 0x28f   : > { %v4297_v48 = vmul.f32 %v1111_v57, %v3820_v43  ;;  %v4309_v43 = vpop.f32.mrf.mxu0  ;;  %v1128_v61 = vsub.f32 1.0, %v4278_v17  ;;  %v933_v28 = vmul.f32 %v4311_v63, %v4228_v42  ;;  %2773 = vmatmul.msk.f32.gmra.mxu3 %vm577_vm1, %v1533_v10  ;;  %v926_v16 = vsel %vm4317_vm15, %v4129_v55, %v922_v3 }
 0x290   : > { %vm900_vm4 = vcmp.eq.f32.partialorder %v899_v21, 8.507059e+37  ;;  %v4339_v62 = vpop.eup %2974  ;;  %vm928_vm14 = vcmp.eq.f32.partialorder %v927_v18, 8.507059e+37  ;;  %1695 = vmatpush.msra.mxu3 %v1462_v24  ;;  %vm1117_vm2 = vweird.f32 %v4013_v37  ;;  %vm1118_vm3 = vweird.f32 %v4082_v20  ;;  %v1470_v21 = vpop.f32.mrf.mxu2 }
 0x291   : > { %v1512_v56 = vsel %vm3959_vm12, %v4297_v48, 0.0  ;;  %v903_v44 = vsel %vm900_vm4, %v4121_v41, %v898_v45  ;;  %v934_v39 = vsub.f32 1.0, %v933_v28  ;;  %v931_v4 = vsel %vm928_vm14, %v4140_v35, %v926_v16  ;;  %vm4346_vm5 = vmor %vm1117_vm2, %vm1118_vm3 }
 0x292   : > { %2790 = vmatmul.msk.f32.vlgmr.msrb.gmra.mxu2 %vm577_vm1, %v1512_v56  ;;  %v958_v14 = vmul.f32 %v3815_v32, %v903_v44  ;;  %v1121_v55 = vand.u32 2147483647, %v4013_v37  ;;  %v1123_v17 = vand.u32 2147483648, %v4013_v37  ;;  %vm937_vm9 = vweird.f32 %v4228_v42 }
 0x293   : > { %v960_v57 = vmul.f32 %v3835_v60, %v931_v4  ;;  %v1120_v35 = vsel %vm4346_vm5, %v4082_v20, %v1116_v11  ;;  %v1141_v50 = vmul.f32 %v4339_v62, %v4236_v58  ;;  %v935_v0 = vmul.f32 %v4311_v63, %v934_v39 }
 0x294   : > { %v4355_v32 = vmul.f32 %v958_v14, %v324_v1  ;;  %v1124_v24 = vor.u32 1.1754944e-38, %v1123_v17  ;;  %v908_v37 = vadd.f32 %v4197_v47, %v907_v53  ;;  %vm1122_vm15 = vcmp.eq.f32.partialorder %v1121_v55, 8.507059e+37  ;;  %v325_v1 = vld [vmem:[%s3402_s5 + $0x68] sm:$0xff] }
 0x295   : > { %v4375_v20 = vmul.f32 %v960_v57, %v326_v19  ;;  %v913_v45 = vand.u32 2147483647, %v4110_v25  ;;  %vm938_vm4 = vweird.f32 %v4311_v63  ;;  %v943_v53 = vand.u32 2147483648, %v4228_v42 }
 0x296   : > { %v1014_v60 = vsel %vm577_vm1, %v4355_v32, 0.0  ;;  %v1125_v3 = vsel %vm1122_vm15, %v1124_v24, %v1120_v35  ;;  %v912_v18 = vsel %vm4369_vm8, %v4197_v47, %v908_v37  ;;  %v1534_v25 = vsel %vm3953_vm11, %v4297_v48, 0.0  ;;  %vm4402_vm10 = vmor %vm937_vm9, %vm938_vm4  ;;  %v4431_v17 = vpop.f32.mrf.mxu1 }
 0x297   : > { %1015 = vadd.xlane.f32.xlu2 %v1014_v60  ;;  %v4383_v52 = vpop.f32.mrf.mxu0  ;;  %v1020_v10 = vsel %vm577_vm1, %v4375_v20, 0.0  ;;  %v4388_v56 = vmul.f32 %v1125_v3, %v3802_v23  ;;  %vm914_vm6 = vcmp.eq.f32.partialorder %v913_v45, 8.507059e+37  ;;  %v1129_v11 = vmul.f32 %v4238_v27, %v1128_v61  ;;  %2774 = vmatmul.msk.f32.vlgmr.msra.gmra.mxu3 %vm577_vm1, %v1534_v25 }
 0x298   : > { %v1142_v28 = vsub.f32 1.0, %v1141_v50  ;;  %1021 = vadd.xlane.f32.xlu1 %v1020_v10  ;;  %v917_v47 = vsel %vm914_vm6, %v4242_v54, %v912_v18  ;;  %v936_v44 = vadd.f32 %v4311_v63, %v935_v0  ;;  %v1468_v54 = vadd.f32 %v3910_v33, %v4266_v12 }
 0x299   : > { %v1513_v61 = vsel %vm4125_vm7, %v4388_v56, 0.0  ;;  %v959_v16 = vmul.f32 %v3845_v26, %v917_v47  ;;  %v941_v39 = vand.u32 2147483647, %v4228_v42  ;;  %v1471_v19 = vadd.f32 %v3910_v33, %v1470_v21 }
 0x29a   : > { %2791 = vmatmul.msk.f32.gmra.mxu2 %vm577_vm1, %v1513_v61  ;;  %v940_v14 = vsel %vm4402_vm10, %v4311_v63, %v936_v44  ;;  %v944_v4 = vor.u32 1.1754944e-38, %v943_v53  ;;  %vm4422_vm14 = vcmp.eq.s32.totalorder %v3927_v51, %v3925_v49  ;;  %v1143_v55 = vmul.f32 %v4339_v62, %v1142_v28  ;;  %v1473_v63 = vpop.f32.mrf.mxu2  ;;  %v327_v49 = vld [vmem:[%s3402_s5 + $0x78] sm:$0xff] }
 0x29b   : > { %v4418_v41 = vmul.f32 %v959_v16, %v325_v1  ;;  %v1556_v12 = vsel %vm4422_vm14, %v4297_v48, 0.0  ;;  %vm942_vm2 = vcmp.eq.f32.partialorder %v941_v39, 8.507059e+37  ;;  %1723 = vmatpush.msrb.mxu3 %v1471_v19  ;;  %v1130_v42 = vadd.f32 %v4238_v27, %v1129_v11 }
 0x29c   : > { %v945_v35 = vsel %vm942_vm2, %v944_v4, %v940_v14  ;;  %vm1131_vm3 = vweird.f32 %v4142_v22  ;;  %vm1132_vm5 = vweird.f32 %v4238_v27  ;;  %v1135_v0 = vand.u32 2147483647, %v4142_v22  ;;  %v5216_v14 = vld [vmem:[#allocation16_spill] sm:$0xff] }
 0x29d   : > { %v1017_v57 = vsel %vm577_vm1, %v4418_v41, 0.0  ;;  %v961_v50 = vmul.f32 %v3860_v59, %v945_v35  ;;  %1724 = vmatpush.msrb.mxu3 %v1468_v54  ;;  %vm4439_vm9 = vmor %vm1131_vm3, %vm1132_vm5  ;;  %v1137_v24 = vand.u32 2147483648, %v4142_v22  ;;  %v1580_v21 = vsel %vm577_vm1, %v1556_v12, 0.0 }
 0x29e   : > { %1018 = vadd.xlane.f32.xlu0 %v1017_v57  ;;  %v1535_v29 = vsel %vm4076_vm13, %v4388_v56, 0.0  ;;  %vm4451_vm8 = vcmp.eq.s32.totalorder %v3927_v51, %v4047_v15  ;;  %v1134_v60 = vsel %vm4439_vm9, %v4238_v27, %v1130_v42  ;;  %vm1136_vm15 = vcmp.eq.f32.partialorder %v1135_v0, 8.507059e+37  ;;  %v4483_v61 = vpop.f32.mrf.mxu1 }
 0x29f   : > { %v1334_v37 = vpop.f32.mrf.mxu0  ;;  %2775 = vmatmul.msk.f32.gmra.mxu3 %vm577_vm1, %v1535_v29  ;;  %v4459_v22 = vmul.f32 %v961_v50, %v327_v49  ;;  %v1138_v45 = vor.u32 1.1754944e-38, %v1137_v24  ;;  %v1144_v53 = vadd.f32 %v4339_v62, %v1143_v55  ;;  %vm1145_vm4 = vweird.f32 %v4236_v58 }
 0x2a0   : > { %1581 = vadd.xlane.f32.xlu1 %v1580_v21  ;;  %vm1146_vm6 = vweird.f32 %v4339_v62  ;;  %v1149_v51 = vand.u32 2147483647, %v4236_v58  ;;  %v1151_v15 = vand.u32 2147483648, %v4236_v58  ;;  %v1552_v27 = vsel %vm4422_vm14, %v4016_v46, 0.0 }
 0x2a1   : > { %v1023_v3 = vsel %vm577_vm1, %v4459_v22, 0.0  ;;  %v1139_v18 = vsel %vm1136_vm15, %v1138_v45, %v1134_v60  ;;  %vm1147_vm10 = vmor %vm1145_vm4, %vm1146_vm6  ;;  %v1553_v10 = vsel %vm4451_vm8, %v4135_v8, 0.0  ;;  %v1568_v28 = vsel %vm577_vm1, %v1552_v27, 0.0 }
 0x2a2   : > { %1024 = vadd.xlane.f32.xlu2 %v1023_v3  ;;  %v4475_v25 = vmul.f32 %v1139_v18, %v3843_v5  ;;  %v1148_v11 = vsel %vm1147_vm10, %v4339_v62, %v1144_v53  ;;  %v1152_v58 = vor.u32 1.1754944e-38, %v1151_v15  ;;  %vm1150_vm2 = vcmp.eq.f32.partialorder %v1149_v51, 8.507059e+37  ;;  %v1476_v8 = vpop.f32.mrf.mxu2  ;;  %v5215_v62 = vld [vmem:[#allocation18_spill] sm:$0xff] }
 0x2a3   : > { %v1332_v1 = vadd.f32 %v3904_v9, %v4383_v52  ;;  %v1335_v47 = vadd.f32 %v3904_v9, %v1334_v37  ;;  %v1571_v44 = vsel %vm577_vm1, %v1553_v10, 0.0  ;;  %v1554_v16 = vsel %vm4422_vm14, %v5215_v62, 0.0 }
 0x2a4   : > { %v1153_v46 = vsel %vm1150_vm2, %v1152_v58, %v1148_v11  ;;  %v1536_v5 = vsel %vm3953_vm11, %v4475_v25, 0.0  ;;  %v1474_v54 = vadd.f32 %v3910_v33, %v1473_v63  ;;  %v1477_v52 = vadd.f32 %v3910_v33, %v1476_v8 }
 0x2a5   : > { %1984 = vmatpush.msra.mxu0 %v1335_v47  ;;  %v4495_v39 = vmul.f32 %v1153_v46, %v5216_v14  ;;  %v1558_v19 = vsel %vm4422_vm14, %v4475_v25, 0.0  ;;  %v1574_v4 = vsel %vm577_vm1, %v1554_v16, 0.0  ;;  %v1557_v42 = vsel %vm4451_vm8, %v4388_v56, 0.0 }
 0x2a6   : > { %1569 = vadd.xlane.f32.xlu0 %v1568_v28  ;;  %1752 = vmatpush.msra.mxu3 %v1477_v52  ;;  %v1586_v12 = vsel %vm577_vm1, %v1558_v19, 0.0  ;;  %v4515_v48 = vpop.f32.mrf.mxu1  ;;  %v1555_v56 = vsel %vm4451_vm8, %v4262_v13, 0.0  ;;  %v1583_v0 = vsel %vm577_vm1, %v1557_v42, 0.0 }
 0x2a7   : > { %v1337_v23 = vpop.f32.mrf.mxu0  ;;  %2776 = vmatmul.msk.f32.vlgmr.msrb.gmra.mxu3 %vm577_vm1, %v1536_v5  ;;  %1985 = vmatpush.msra.mxu0 %v1332_v1  ;;  %v1559_v55 = vsel %vm4451_vm8, %v4495_v39, 0.0  ;;  %v1537_v49 = vsel %vm4076_vm13, %v4495_v39, 0.0  ;;  %v1577_v24 = vsel %vm577_vm1, %v1555_v56, 0.0 }
 0x2a8   : > { %1572 = vadd.xlane.f32.xlu1 %v1571_v44  ;;  %1753 = vmatpush.msra.mxu3 %v1474_v54  ;;  %v1589_v57 = vsel %vm577_vm1, %v1559_v55, 0.0  ;;  %v1338_v35 = vadd.f32 %v3904_v9, %v1337_v23 }
 0x2aa   : > { %1575 = vadd.xlane.f32.xlu2 %v1574_v4  ;;  %v1479_v13 = vpop.f32.mrf.mxu2 }
 0x2ab   : > { %v1480_v27 = vadd.f32 %v3910_v33, %v1479_v13 }
 0x2ae   : > { %1587 = vadd.xlane.f32.xlu0 %v1586_v12  ;;  %v4522_v21 = vpop.f32.mrf.mxu1 }
 0x2af   : > { %v1340_v63 = vpop.f32.mrf.mxu0  ;;  %2777 = vmatmul.msk.f32.gmra.mxu3 %vm577_vm1, %v1537_v49 }
 0x2b0   : > { %v1341_v50 = vadd.f32 %v3904_v9, %v1340_v63  ;;  %1590 = vadd.xlane.f32.xlu1 %v1589_v57  ;;  %v5217_v63 = vld [vmem:[#allocation17_spill] sm:$0xff] }
 0x2b2   : > { %2013 = vmatpush.msra.mxu1 %v1341_v50  ;;  %1584 = vadd.xlane.f32.xlu2 %v1583_v0  ;;  %v1482_v15 = vpop.f32.mrf.mxu2 }
 0x2b3   : > { %v1483_v3 = vadd.f32 %v3910_v33, %v1482_v15 }
 0x2b4   : > { %2014 = vmatpush.msra.mxu1 %v1338_v35 }
 0x2b5   : > { %1781 = vmatpush.msrb.mxu3 %v1483_v3 }
 0x2b6   : > { %1578 = vadd.xlane.f32.xlu0 %v1577_v24  ;;  %v4526_v53 = vpop.f32.mrf.mxu1 }
 0x2b7   : > { %v1343_v37 = vpop.f32.mrf.mxu0  ;;  %1782 = vmatpush.msrb.mxu3 %v1480_v27 }
 0x2b8   : > { %v1344_v60 = vadd.f32 %v3904_v9, %v1343_v37 }
 0x2ba   : > { %v1485_v1 = vpop.f32.mrf.mxu2 }
 0x2bb   : > { %v1486_v35 = vadd.f32 %v3910_v33, %v1485_v1 }
 0x2be   : > { %v4528_v51 = vpop.f32.mrf.mxu1 }
 0x2bf   : > { %v1346_v29 = vpop.f32.mrf.mxu0 }
 0x2c0   : > { %v1347_v45 = vadd.f32 %v3904_v9, %v1346_v29 }
 0x2c2   : > { %2042 = vmatpush.msra.mxu2 %v1347_v45  ;;  %v1488_v4 = vpop.f32.mrf.mxu2 }
 0x2c3   : > { %v1489_v42 = vadd.f32 %v3910_v33, %v1488_v4 }
 0x2c4   : > { %2043 = vmatpush.msra.mxu2 %v1344_v60 }
 0x2c6   : > { %v4532_v18 = vpop.f32.mrf.mxu1 }
 0x2ce   : > { %v4534_v11 = vpop.f32.mrf.mxu1 }
 0x2d6   : > { %v4536_v44 = vpop.f32.mrf.mxu1 }
 0x2de   : > { %v4540_v49 = vpop.f32.mrf.mxu1 }
 0x2e2   : > { %v1004_v10 = vpop.xlane.xlu1 %1003 }
 0x2e3   : > { %v1034_v9 = vadd.f32 1e-10, %v1004_v10 }
 0x2e5   : > { %2976 = vrcp.f32 %v1034_v9  ;;  %v1165_v8 = vand.u32 2147483648, %v1034_v9  ;;  %v1163_v62 = vand.u32 2147483647, %v1034_v9  ;;  %vm1159_vm5 = vweird.f32 %v1034_v9 }
 0x2e7   : > { %v1166_v52 = vor.u32 1.1754944e-38, %v1165_v8  ;;  %vm1164_vm15 = vcmp.eq.f32.partialorder %v1163_v62, 8.507059e+37 }
 0x2ea   : > { %v1007_v58 = vpop.xlane.xlu2 %1006 }
 0x2eb   : > { %v2977_v28 = vpop.eup %2976  ;;  %v1035_v46 = vadd.f32 1e-10, %v1007_v58  ;;  %v5218_v58 = vld [vmem:[#allocation19_spill] sm:$0xff] }
 0x2ec   : > { %v1155_v47 = vmul.f32 %v2977_v28, %v1034_v9  ;;  %vm1160_vm3 = vweird.f32 %v2977_v28 }
 0x2ed   : > { %2978 = vrcp.f32 %v1035_v46  ;;  %vm1161_vm9 = vmor %vm1159_vm5, %vm1160_vm3  ;;  %v1177_v29 = vand.u32 2147483647, %v1035_v46  ;;  %vm1173_vm6 = vweird.f32 %v1035_v46  ;;  %v1179_v60 = vand.u32 2147483648, %v1035_v46 }
 0x2ee   : > { %v1156_v23 = vsub.f32 1.0, %v1155_v47  ;;  %v4557_v47 = vpop.f32.mrf.mxu1 }
 0x2ef   : > { %v1180_v13 = vor.u32 1.1754944e-38, %v1179_v60  ;;  %vm1178_vm2 = vcmp.eq.f32.partialorder %v1177_v29, 8.507059e+37 }
 0x2f0   : > { %v1157_v5 = vmul.f32 %v2977_v28, %v1156_v23 }
 0x2f2   : > { %v1158_v16 = vadd.f32 %v2977_v28, %v1157_v5  ;;  %v4567_v5 = vpop.f32.mrf.mxu0 }
 0x2f3   : > { %v2979_v54 = vpop.eup %2978 }
 0x2f4   : > { %v1169_v14 = vmul.f32 %v2979_v54, %v1035_v46  ;;  %v1162_v19 = vsel %vm1161_vm9, %v2977_v28, %v1158_v16  ;;  %vm1174_vm4 = vweird.f32 %v2979_v54  ;;  %v4555_v1 = vpop.f32.mrf.mxu3 }
 0x2f5   : > { %v1167_v55 = vsel %vm1164_vm15, %v1166_v52, %v1162_v19  ;;  %vm1175_vm10 = vmor %vm1173_vm6, %vm1174_vm4 }
 0x2f6   : > { %v1170_v12 = vsub.f32 1.0, %v1169_v14  ;;  %v1274_v57 = vmul.f32 %v1167_v55, %v5217_v63  ;;  %v4573_v63 = vpop.f32.mrf.mxu1 }
 0x2f8   : > { %v1171_v50 = vmul.f32 %v2979_v54, %v1170_v12  ;;  %v1538_v56 = vsel %vm3953_vm11, %v1274_v57, 0.0  ;;  %v1516_v0 = vsel %vm3959_vm12, %v1274_v57, 0.0  ;;  %v1560_v24 = vsel %vm4422_vm14, %v1274_v57, 0.0 }
 0x2f9   : > { %2778 = vmatmul.msk.f32.vlgmr.msra.gmra.mxu3 %vm577_vm1, %v1538_v56  ;;  %2794 = vmatmul.msk.f32.vlgmr.msra.gmra.mxu0 %vm577_vm1, %v1516_v0  ;;  %v1592_v37 = vsel %vm577_vm1, %v1560_v24, 0.0 }
 0x2fa   : > { %1593 = vadd.xlane.f32.xlu2 %v1592_v37  ;;  %v1172_v33 = vadd.f32 %v2979_v54, %v1171_v50  ;;  %1810 = vmatpush.msra.mxu3 %v1489_v42 }
 0x2fc   : > { %v1176_v45 = vsel %vm1175_vm10, %v2979_v54, %v1172_v33  ;;  %1811 = vmatpush.msra.mxu3 %v1486_v35  ;;  %v1013_v15 = vpop.xlane.xlu1 %1012  ;;  %v1010_v27 = vpop.xlane.xlu0 %1009 }
 0x2fd   : > { %v1037_v3 = vadd.f32 1e-10, %v1013_v15  ;;  %v1036_v10 = vadd.f32 1e-10, %v1010_v27  ;;  %v1181_v9 = vsel %vm1178_vm2, %v1180_v13, %v1176_v45  ;;  %v1491_v54 = vpop.f32.mrf.mxu2  ;;  %v4579_v15 = vpop.f32.mrf.mxu0 }
 0x2fe   : > { %v4553_v28 = vmul.f32 %v1181_v9, %v5218_v58  ;;  %v4581_v58 = vld [vmem:[#allocation8 + $0x1] ss:$0 sm:$0xff] }
 0x2ff   : > { %2980 = vrcp.f32 %v1037_v3  ;;  %v1207_v42 = vand.u32 2147483648, %v1037_v3  ;;  %v1193_v35 = vand.u32 2147483648, %v1036_v10  ;;  %v1205_v56 = vand.u32 2147483647, %v1037_v3 }
 0x300   : > { %2982 = vrcp.f32 %v1036_v10  ;;  %v1539_v46 = vsel %vm4076_vm13, %v4553_v28, 0.0  ;;  %v1517_v23 = vsel %vm4125_vm7, %v4553_v28, 0.0  ;;  %v1191_v24 = vand.u32 2147483647, %v1036_v10 }
 0x301   : > { %2779 = vmatmul.msk.f32.gmra.mxu3 %vm577_vm1, %v1539_v46  ;;  %2795 = vmatmul.msk.f32.gmra.mxu0 %vm577_vm1, %v1517_v23  ;;  %v4569_v55 = vpop.f32.mrf.mxu3  ;;  %vm1201_vm9 = vweird.f32 %v1037_v3  ;;  %vm1187_vm15 = vweird.f32 %v1036_v10  ;;  %v1208_v60 = vor.u32 1.1754944e-38, %v1207_v42  ;;  %v1194_v45 = vor.u32 1.1754944e-38, %v1193_v35 }
 0x302   : > { %vm1206_vm10 = vcmp.eq.f32.partialorder %v1205_v56, 8.507059e+37  ;;  %vm1192_vm2 = vcmp.eq.f32.partialorder %v1191_v24, 8.507059e+37  ;;  %v4607_v56 = vpop.f32.mrf.mxu1 }
 0x305   : > { %v2981_v8 = vpop.eup %2980  ;;  %v1494_v46 = vpop.f32.mrf.mxu2 }
 0x306   : > { %v2983_v62 = vpop.eup %2982  ;;  %v1197_v16 = vmul.f32 %v2981_v8, %v1037_v3  ;;  %vm1202_vm3 = vweird.f32 %v2981_v8 }
 0x307   : > { %v1183_v52 = vmul.f32 %v2983_v62, %v1036_v10  ;;  %vm1188_vm5 = vweird.f32 %v2983_v62  ;;  %vm1203_vm4 = vmor %vm1201_vm9, %vm1202_vm3 }
 0x308   : > { %v1198_v14 = vsub.f32 1.0, %v1197_v16  ;;  %vm1189_vm6 = vmor %vm1187_vm15, %vm1188_vm5 }
 0x309   : > { %v1184_v4 = vsub.f32 1.0, %v1183_v52  ;;  %v3026_v52 = vld [vmem:[#allocation8 + $0x2] ss:$0 sm:$0xff]  ;;  %v4599_v35 = vpop.f32.mrf.mxu3 }
 0x30a   : > { %v1016_v19 = vpop.xlane.xlu2 %1015  ;;  %v1199_v57 = vmul.f32 %v2981_v8, %v1198_v14  ;;  %v1495_v14 = vadd.f32 %v3026_v52, %v1494_v46 }
 0x30b   : > { %v4571_v12 = vadd.f32 1e-10, %v1016_v19  ;;  %v1022_v50 = vpop.xlane.xlu1 %1021  ;;  %v1185_v0 = vmul.f32 %v2983_v62, %v1184_v4  ;;  %v4591_v4 = vadd.f32 %v4581_v58, %v4245_v34 }
 0x30c   : > { %v4576_v37 = vadd.f32 1e-10, %v1022_v50  ;;  %v1200_v29 = vadd.f32 %v2981_v8, %v1199_v57  ;;  %v1492_v57 = vadd.f32 %v3026_v52, %v1491_v54 }
 0x30d   : > { %2984 = vrcp.f32 %v4571_v12  ;;  %v1186_v33 = vadd.f32 %v2983_v62, %v1185_v0  ;;  %v1221_v24 = vand.u32 2147483648, %v4571_v12  ;;  %v1219_v46 = vand.u32 2147483647, %v4571_v12 }
 0x30e   : > { %2986 = vrcp.f32 %v4576_v37  ;;  %v1204_v13 = vsel %vm1203_vm4, %v2981_v8, %v1200_v29  ;;  %vm1215_vm5 = vweird.f32 %v4571_v12 }
 0x30f   : > { %v1209_v27 = vsel %vm1206_vm10, %v1208_v60, %v1204_v13  ;;  %v1190_v9 = vsel %vm1189_vm6, %v2983_v62, %v1186_v33  ;;  %v4617_v33 = vadd.f32 %v4581_v58, %v4352_v36  ;;  %v4621_v60 = vadd.f32 %v4581_v58, %v4526_v53  ;;  %v4630_v36 = vld [vmem:[#allocation8] ss:$0 sm:$0xff] }
 0x310   : > { %v4584_v3 = vmul.f32 %v1209_v27, %v4232_v2  ;;  %v1195_v10 = vsel %vm1192_vm2, %v1194_v45, %v1190_v9  ;;  %v4634_v53 = vadd.f32 %v4630_v36, %v4309_v43  ;;  %vm1220_vm4 = vcmp.eq.f32.partialorder %v1219_v46, 8.507059e+37 }
 0x311   : > { %v1019_v23 = vpop.xlane.xlu0 %1018  ;;  %v1276_v8 = vmul.f32 %v1195_v10, %v4234_v30  ;;  %v4638_v10 = vadd.f32 %v4581_v58, %v4528_v51  ;;  %vm1243_vm6 = vweird.f32 %v4576_v37  ;;  %v1353_v59 = vadd.f32 %v4630_v36, %v4579_v15 }
 0x312   : > { %v4586_v19 = vadd.f32 1e-10, %v1019_v23  ;;  %v1563_v2 = vsel %vm4451_vm8, %v4584_v3, 0.0 }
 0x313   : > { %v2985_v16 = vpop.eup %2984  ;;  %v4594_v42 = vpop.xlane.xlu1 %1581  ;;  %v1601_v50 = vsel %vm577_vm1, %v1563_v2, 0.0  ;;  %v1540_v30 = vsel %vm3953_vm11, %v1276_v8, 0.0  ;;  %v1518_v54 = vsel %vm3959_vm12, %v1276_v8, 0.0  ;;  %v1562_v29 = vsel %vm4422_vm14, %v1276_v8, 0.0 }
 0x314   : > { %v1211_v62 = vmul.f32 %v2985_v16, %v4571_v12  ;;  %2988 = vrcp.f32 %v4586_v19  ;;  %v4605_v34 = vpop.eup %2986  ;;  %1602 = vadd.xlane.f32.xlu2 %v1601_v50  ;;  %2780 = vmatmul.msk.f32.vlgmr.msrb.gmra.mxu3 %vm577_vm1, %v1540_v30  ;;  %v1598_v27 = vsel %vm577_vm1, %v1562_v29, 0.0  ;;  %vm1216_vm3 = vweird.f32 %v2985_v16  ;;  %v4652_v30 = vpop.f32.mrf.mxu0 }
 0x315   : > { %v1239_v45 = vmul.f32 %v4605_v34, %v4576_v37  ;;  %2796 = vmatmul.msk.f32.vlgmr.msra.gmra.mxu1 %vm577_vm1, %v1518_v54  ;;  %v1025_v13 = vpop.xlane.xlu2 %1024  ;;  %1839 = vmatpush.msrb.mxu3 %v1495_v14  ;;  %vm1217_vm9 = vmor %vm1215_vm5, %vm1216_vm3  ;;  %vm1244_vm15 = vweird.f32 %v4605_v34  ;;  %v1249_v50 = vand.u32 2147483648, %v4576_v37  ;;  %v1541_v54 = vsel %vm4076_vm13, %v4584_v3, 0.0 }
 0x316   : > { %v1212_v0 = vsub.f32 1.0, %v1211_v62  ;;  %v4628_v23 = vadd.f32 1e-10, %v1025_v13  ;;  %1599 = vadd.xlane.f32.xlu1 %v1598_v27  ;;  %v1222_v62 = vor.u32 1.1754944e-38, %v1221_v24  ;;  %v1233_v13 = vand.u32 2147483647, %v4586_v19  ;;  %vm4668_vm10 = vmor %vm1243_vm6, %vm1244_vm15 }
 0x317   : > { %v1240_v52 = vsub.f32 1.0, %v1239_v45  ;;  %1840 = vmatpush.msrb.mxu3 %v1492_v57  ;;  %v1247_v57 = vand.u32 2147483647, %v4576_v37  ;;  %v1235_v46 = vand.u32 2147483648, %v4586_v19  ;;  %vm1229_vm3 = vweird.f32 %v4586_v19 }
 0x318   : > { %v1213_v9 = vmul.f32 %v2985_v16, %v1212_v0  ;;  %2990 = vrcp.f32 %v4628_v23  ;;  %v1261_v37 = vand.u32 2147483647, %v4628_v23 }
 0x319   : > { %v4645_v2 = vpop.xlane.xlu0 %1569  ;;  %v1241_v51 = vmul.f32 %v4605_v34, %v1240_v52  ;;  %v4673_v52 = vpop.f32.mrf.mxu3  ;;  %vm1248_vm2 = vcmp.eq.f32.partialorder %v1247_v57, 8.507059e+37 }
 0x31a   : > { %v1214_v8 = vadd.f32 %v2985_v16, %v1213_v9  ;;  %v2989_v43 = vpop.eup %2988  ;;  %v1519_v9 = vsel %vm4125_vm7, %v4584_v3, 0.0  ;;  %v1250_v3 = vor.u32 1.1754944e-38, %v1249_v50  ;;  %v1872_v50 = vadd.f32 %v4652_v30, %v4555_v1 }
 0x31b   : > { %v1225_v12 = vmul.f32 %v2989_v43, %v4586_v19  ;;  %v1573_v0 = vpop.xlane.xlu1 %1572  ;;  %v1242_v45 = vadd.f32 %v4605_v34, %v1241_v51  ;;  %vm1230_vm5 = vweird.f32 %v2989_v43 }
 0x31c   : > { %v1218_v24 = vsel %vm1217_vm9, %v2985_v16, %v1214_v8  ;;  %2781 = vmatmul.msk.f32.gmra.mxu3 %vm577_vm1, %v1541_v54  ;;  %vm4689_vm9 = vcmp.eq.f32.partialorder %v1233_v13, 8.507059e+37  ;;  %vm1231_vm15 = vmor %vm1229_vm3, %vm1230_vm5  ;;  %v1263_v13 = vand.u32 2147483648, %v4628_v23 }
 0x31d   : > { %v1223_v29 = vsel %vm1220_vm4, %v1222_v62, %v1218_v24  ;;  %v1226_v27 = vsub.f32 1.0, %v1225_v12  ;;  %2797 = vmatmul.msk.f32.gmra.mxu1 %vm577_vm1, %v1519_v9  ;;  %v1246_v8 = vsel %vm4668_vm10, %v4605_v34, %v1242_v45  ;;  %v4680_v62 = vpop.f32.mrf.mxu1  ;;  %v1236_v9 = vor.u32 1.1754944e-38, %v1235_v46 }
 0x31e   : > { %v1278_v16 = vmul.f32 %v1223_v29, %v4355_v32  ;;  %v2991_v32 = vpop.eup %2990  ;;  %5221 = vst [vmem:[#allocation18_spill] sm:$0xff] %v4680_v62  ;;  %v1251_v57 = vsel %vm1248_vm2, %v1250_v3, %v1246_v8  ;;  %v2081_v62 = vmul.f32 %v1573_v0, %v4617_v33  ;;  %vm1262_vm10 = vcmp.eq.f32.partialorder %v1261_v37, 8.507059e+37  ;;  %v1576_v37 = vpop.xlane.xlu2 %1575 }
 0x31f   : > { %v1227_v51 = vmul.f32 %v2989_v43, %v1226_v27  ;;  %v1253_v54 = vmul.f32 %v2991_v32, %v4628_v23  ;;  %v4694_v45 = vmul.f32 %v1251_v57, %v4375_v20  ;;  %vm1258_vm4 = vweird.f32 %v2991_v32 }
 0x320   : > { %v1520_v12 = vsel %vm3959_vm12, %v1278_v16, 0.0  ;;  %v1564_v24 = vsel %vm4422_vm14, %v1278_v16, 0.0  ;;  %v1542_v46 = vsel %vm3953_vm11, %v1278_v16, 0.0  ;;  %v1391_v57 = vadd.f32 %v4581_v58, %v4515_v48 }
 0x321   : > { %2798 = vmatmul.msk.f32.vlgmr.msra.gmra.mxu2 %vm577_vm1, %v1520_v12  ;;  %v1604_v34 = vsel %vm577_vm1, %v1564_v24, 0.0  ;;  %v1588_v29 = vpop.xlane.xlu0 %1587  ;;  %v1228_v27 = vadd.f32 %v2989_v43, %v1227_v51  ;;  %v1254_v14 = vsub.f32 1.0, %v1253_v54  ;;  %v1566_v20 = vsel %vm4422_vm14, %v4694_v45, 0.0  ;;  %v1874_v24 = vpop.f32.mrf.mxu0 }
 0x322   : > { %1605 = vadd.xlane.f32.xlu0 %v1604_v34  ;;  %v4699_v12 = vmul.f32 %v1588_v29, %v4621_v60  ;;  %v1610_v0 = vsel %vm577_vm1, %v1566_v20, 0.0  ;;  %v1326_v51 = vadd.f32 %v4630_v36, %v4230_v31  ;;  %vm1257_vm14 = vweird.f32 %v4628_v23  ;;  %v1929_v29 = vpop.f32.mrf.mxu2 }
 0x323   : > { %v1591_v8 = vpop.xlane.xlu1 %1590  ;;  %v1232_v3 = vsel %vm1231_vm15, %v2989_v43, %v1228_v27  ;;  %v1255_v33 = vmul.f32 %v2991_v32, %v1254_v14  ;;  %1611 = vadd.xlane.f32.xlu2 %v1610_v0  ;;  %v1875_v43 = vadd.f32 %v1874_v24, %v4569_v55  ;;  %v2080_v31 = vmul.f32 %v4645_v2, %v4591_v4  ;;  %vm1259_vm6 = vmor %vm1257_vm14, %vm1258_vm4 }
 0x324   : > { %v4711_v60 = vmul.f32 %v1591_v8, %v4638_v10  ;;  %v1237_v19 = vsel %vm4689_vm9, %v1236_v9, %v1232_v3  ;;  %2782 = vmatmul.msk.f32.vlgmr.msra.gmra.mxu3 %vm577_vm1, %v1542_v46  ;;  %v5224_v10 = vsel %vm4451_vm8, %v4553_v28, 0.0  ;;  %v1264_v55 = vor.u32 1.1754944e-38, %v1263_v13 }
 0x325   : > { %v1279_v26 = vmul.f32 %v1237_v19, %v4418_v41  ;;  %1955 = vmatpush.msra.mxu3 %v4634_v53  ;;  %v1595_v14 = vsel %vm577_vm1, %v5224_v10, 0.0  ;;  %v1256_v16 = vadd.f32 %v2991_v32, %v1255_v33  ;;  %v1697_v53 = vpop.f32.mrf.mxu3  ;;  %v4737_v34 = vadd.f32 %v2081_v62, %v1875_v43  ;;  %v1900_v4 = vpop.f32.mrf.mxu1 }
 0x326   : > { %v1385_v9 = vadd.f32 %v4581_v58, %v4431_v17  ;;  %v1930_v62 = vadd.f32 %v1929_v29, %v1697_v53  ;;  %v4754_v30 = vadd.f32 %v2080_v31, %v1872_v50  ;;  %v2084_v17 = vmul.f32 %v4594_v42, %v1391_v57  ;;  %v1585_v10 = vpop.xlane.xlu2 %1584 }
 0x327   : > { %v1521_v54 = vsel %vm4125_vm7, %v1279_v26, 0.0  ;;  %v1565_v41 = vsel %vm4451_vm8, %v1279_v26, 0.0  ;;  %1956 = vmatpush.msra.mxu3 %v1326_v51  ;;  %v1260_v23 = vsel %vm1259_vm6, %v2991_v32, %v1256_v16  ;;  %v1388_v32 = vadd.f32 %v4581_v58, %v4483_v61 }
 0x328   : > { %v1607_v28 = vsel %vm577_vm1, %v1565_v41, 0.0  ;;  %v1265_v2 = vsel %vm1262_vm10, %v1264_v55, %v1260_v23  ;;  %v2117_v13 = vsel %vm328_vm0, %v4737_v34, 0.0  ;;  %v1543_v48 = vsel %vm4076_vm13, %v1279_v26, 0.0 }
 0x329   : > { %2799 = vmatmul.msk.f32.gmra.mxu2 %vm577_vm1, %v1521_v54  ;;  %1608 = vadd.xlane.f32.xlu1 %v1607_v28  ;;  %v1281_v27 = vmul.f32 %v1265_v2, %v4459_v22  ;;  %v1579_v22 = vpop.xlane.xlu0 %1578  ;;  %v2082_v8 = vmul.f32 %v1576_v37, %v1385_v9  ;;  %v2114_v46 = vsel %vm328_vm0, %v4754_v30, 0.0  ;;  %v4761_v3 = vadd.f32 %v2084_v17, %v1930_v62 }
 0x32a   : > { %1596 = vadd.xlane.f32.xlu0 %v1595_v14  ;;  %v2083_v20 = vmul.f32 %v1579_v22, %v1388_v32  ;;  %v1901_v0 = vadd.f32 %v1900_v4, %v4599_v35  ;;  %v1394_v42 = vadd.f32 %v4581_v58, %v4522_v21  ;;  %v1350_v51 = vadd.f32 %v4630_v36, %v4567_v5  ;;  %v1932_v21 = vpop.f32.mrf.mxu2 }
 0x32b   : > { %v1567_v1 = vsel %vm4451_vm8, %v1281_v27, 0.0  ;;  %2118 = vadd.xlane.f32.xlu2 %v2117_v13  ;;  %v2126_v24 = vsel %vm328_vm0, %v4761_v3, 0.0  ;;  %v1544_v26 = vsel %vm3953_vm11, %v4694_v45, 0.0  ;;  %v1545_v14 = vsel %vm4076_vm13, %v1281_v27, 0.0 }
 0x32c   : > { %2783 = vmatmul.msk.f32.gmra.mxu3 %vm577_vm1, %v1543_v48  ;;  %v1613_v61 = vsel %vm577_vm1, %v1567_v1, 0.0  ;;  %v4776_v43 = vadd.f32 %v2082_v8, %v1901_v0  ;;  %v2085_v5 = vmul.f32 %v1585_v10, %v1394_v42  ;;  %v1514_v54 = vsel %vm3959_vm12, %v4475_v25, 0.0 }
 0x32d   : > { %v1903_v33 = vpop.f32.mrf.mxu1  ;;  %v1700_v35 = vpop.f32.mrf.mxu3  ;;  %v1515_v41 = vsel %vm4125_vm7, %v4495_v39, 0.0  ;;  %v1522_v38 = vsel %vm3959_vm12, %v4694_v45, 0.0  ;;  %v1523_v55 = vsel %vm4125_vm7, %v1281_v27, 0.0  ;;  %v1403_v39 = vadd.f32 %v4581_v58, %v4532_v18 }
 0x32e   : > { %v1904_v19 = vadd.f32 %v1903_v33, %v4673_v52  ;;  %v1933_v52 = vadd.f32 %v1932_v21, %v1700_v35  ;;  %v2120_v36 = vsel %vm328_vm0, %v4776_v43, 0.0  ;;  %v1409_v29 = vadd.f32 %v4581_v58, %v4536_v44 }
 0x32f   : > { %v1406_v37 = vadd.f32 %v4581_v58, %v4534_v11  ;;  %v1412_v22 = vadd.f32 %v4581_v58, %v4540_v49  ;;  %v1415_v49 = vadd.f32 %v4581_v58, %v4557_v47  ;;  %v1418_v21 = vadd.f32 %v4581_v58, %v4573_v63 }
 0x330   : > { %v4778_v15 = vadd.f32 %v2083_v20, %v1904_v19  ;;  %v4787_v16 = vadd.f32 %v2085_v5, %v1933_v52 }
 0x331   : > { %2115 = vadd.xlane.f32.xlu1 %v2114_v46 }
 0x332   : > { %1614 = vadd.xlane.f32.xlu0 %v1613_v61  ;;  %v2123_v6 = vsel %vm328_vm0, %v4778_v15, 0.0  ;;  %v2129_v31 = vsel %vm328_vm0, %v4787_v16, 0.0 }
 0x333   : > { %2127 = vadd.xlane.f32.xlu2 %v2126_v24 }
 0x334   : > { %2784 = vmatmul.msk.f32.vlgmr.msrb.gmra.mxu3 %vm577_vm1, %v1544_v26 }
 0x335   : > { %2071 = vmatpush.msrb.mxu3 %v1353_v59  ;;  %v4807_v25 = vpop.f32.mrf.mxu3 }
 0x337   : > { %2072 = vmatpush.msrb.mxu3 %v1350_v51 }
 0x339   : > { %2124 = vadd.xlane.f32.xlu1 %v2123_v6 }
 0x33a   : > { %2121 = vadd.xlane.f32.xlu0 %v2120_v36 }
 0x33c   : > { %2785 = vmatmul.msk.f32.gmra.mxu3 %vm577_vm1, %v1545_v14 }
 0x33d   : > { %v4809_v53 = vpop.f32.mrf.mxu3 }
 0x342   : > { %2130 = vadd.xlane.f32.xlu0 %v2129_v31 }
 0x344   : > { %2792 = vmatmul.msk.f32.vlgmr.msra.gmra.mxu3 %vm577_vm1, %v1514_v54 }
 0x34c   : > { %2793 = vmatmul.msk.f32.gmra.mxu3 %vm577_vm1, %v1515_v41  ;;  %v3232_v41 = vmov 32.0  }
 0x34d   : > { %2992 = vrcp.f32 %v3232_v41 }
 0x354   : > { %2800 = vmatmul.msk.f32.vlgmr.msrb.gmra.mxu3 %vm577_vm1, %v1522_v38 }
 0x35c   : > { %2801 = vmatmul.msk.f32.gmra.mxu3 %vm577_vm1, %v1523_v55  ;;  %v2993_v55 = vpop.eup %2992 }
 0x35d   : > { %v2163_v63 = vmul.f32 32.0, %v2993_v55  ;;  %vm2167_vm1 = vweird.f32 %v2993_v55 }
 0x36d   : > { %v1594_v28 = vpop.xlane.xlu2 %1593 }
 0x36e   : > { %v2088_v2 = vmul.f32 %v1594_v28, %v1403_v39  ;;  %v2164_v28 = vsub.f32 1.0, %v2163_v63 }
 0x376   : > { %v1987_v23 = vpop.f32.mrf.mxu0 }
 0x37c   : > { %v1755_v4 = vpop.f32.mrf.mxu3 }
 0x37d   : > { %v1988_v7 = vadd.f32 %v1987_v23, %v1755_v4  ;;  %v2165_v23 = vmul.f32 %v2993_v55, %v2164_v28 }
 0x37e   : > { %v1990_v48 = vpop.f32.mrf.mxu0 }
 0x37f   : > { %v4813_v45 = vadd.f32 %v2088_v2, %v1988_v7 }
 0x381   : > { %v2138_v40 = vsel %vm328_vm0, %v4813_v45, 0.0 }
 0x382   : > { %2139 = vadd.xlane.f32.xlu0 %v2138_v40 }
 0x384   : > { %v1758_v57 = vpop.f32.mrf.mxu3 }
 0x385   : > { %v1991_v17 = vadd.f32 %v1990_v48, %v1758_v57  ;;  %v2166_v57 = vadd.f32 %v2993_v55, %v2165_v23 }
 0x387   : > { %v1603_v8 = vpop.xlane.xlu2 %1602 }
 0x388   : > { %v2091_v59 = vmul.f32 %v1603_v8, %v1412_v22 }
 0x389   : > { %v1600_v27 = vpop.xlane.xlu1 %1599 }
 0x38a   : > { %v2090_v18 = vmul.f32 %v1600_v27, %v1409_v29  ;;  %v4853_v27 = vsel %vm2167_vm1, %v2993_v55, %v2166_v57 }
 0x392   : > { %v2016_v9 = vpop.f32.mrf.mxu1 }
 0x395   : > { %v1606_v50 = vpop.xlane.xlu0 %1605 }
 0x396   : > { %v2092_v26 = vmul.f32 %v1606_v50, %v1415_v49  ;;  %v1612_v7 = vpop.xlane.xlu2 %1611 }
 0x397   : > { %v1784_v32 = vpop.f32.mrf.mxu3 }
 0x398   : > { %v2017_v62 = vadd.f32 %v2016_v9, %v1784_v32 }
 0x39a   : > { %v4821_v13 = vadd.f32 %v2090_v18, %v2017_v62  ;;  %v2019_v46 = vpop.f32.mrf.mxu1 }
 0x39c   : > { %v2144_v44 = vsel %vm328_vm0, %v4821_v13, 0.0  ;;  %v1609_v5 = vpop.xlane.xlu1 %1608 }
 0x39d   : > { %v1597_v1 = vpop.xlane.xlu0 %1596  ;;  %2145 = vadd.xlane.f32.xlu2 %v2144_v44  ;;  %v2093_v6 = vmul.f32 %v1609_v5, %v1418_v21 }
 0x39e   : > { %v2089_v61 = vmul.f32 %v1597_v1, %v1406_v37  ;;  %v2119_v37 = vpop.xlane.xlu2 %2118 }
 0x39f   : > { %v1787_v33 = vpop.f32.mrf.mxu3 }
 0x3a0   : > { %v4827_v20 = vadd.f32 %v2089_v61, %v1991_v17  ;;  %v2020_v0 = vadd.f32 %v2019_v46, %v1787_v33  ;;  %v5225_v46 = vld [vmem:[#allocation18_spill] sm:$0xff] }
 0x3a2   : > { %v2141_v11 = vsel %vm328_vm0, %v4827_v20, 0.0  ;;  %v4831_v19 = vadd.f32 %v2091_v59, %v2020_v0 }
 0x3a3   : > { %2142 = vadd.xlane.f32.xlu1 %v2141_v11 }
 0x3a4   : > { %v2147_v42 = vsel %vm328_vm0, %v4831_v19, 0.0  ;;  %v2045_v51 = vpop.f32.mrf.mxu2  ;;  %v2116_v50 = vpop.xlane.xlu1 %2115 }
 0x3a5   : > { %2148 = vadd.xlane.f32.xlu0 %v2147_v42  ;;  %v2169_v32 = vmul.f32 %v4853_v27, %v2116_v50  ;;  %v1615_v62 = vpop.xlane.xlu0 %1614 }
 0x3a6   : > { %v2128_v42 = vpop.xlane.xlu2 %2127 }
 0x3a7   : > { %v1813_v24 = vpop.f32.mrf.mxu3  ;;  %v4863_v48 = vsub.f32 %v4754_v30, %v2169_v32  ;;  %v1424_v30 = vadd.f32 %v4581_v58, %v5225_v46 }
 0x3a8   : > { %v2046_v35 = vadd.f32 %v2045_v51, %v1813_v24 }
 0x3a9   : > { %v2201_v8 = vmul.f32 %v4863_v48, %v4863_v48  ;;  %v2095_v51 = vmul.f32 %v1615_v62, %v1424_v30 }
 0x3aa   : > { %v4837_v10 = vadd.f32 %v2092_v26, %v2046_v35  ;;  %v2173_v26 = vmul.f32 %v4853_v27, %v2128_v42 }
 0x3ab   : > { %v2217_v49 = vsel %vm328_vm0, %v2201_v8, 0.0 }
 0x3ac   : > { %v2150_v52 = vsel %vm328_vm0, %v4837_v10, 0.0  ;;  %v2048_v36 = vpop.f32.mrf.mxu2  ;;  %v2125_v22 = vpop.xlane.xlu1 %2124 }
 0x3ad   : > { %2151 = vadd.xlane.f32.xlu1 %v2150_v52  ;;  %v2172_v44 = vmul.f32 %v4853_v27, %v2125_v22  ;;  %v2122_v11 = vpop.xlane.xlu0 %2121  ;;  %v4893_v52 = vsub.f32 %v4761_v3, %v2173_v26 }
 0x3ae   : > { %v2171_v35 = vmul.f32 %v4853_v27, %v2122_v11 }
 0x3af   : > { %v1816_v47 = vpop.f32.mrf.mxu3  ;;  %v4879_v59 = vsub.f32 %v4778_v15, %v2172_v44 }
 0x3b0   : > { %v2049_v14 = vadd.f32 %v2048_v36, %v1816_v47 }
 0x3b1   : > { %v2204_v15 = vmul.f32 %v4879_v59, %v4879_v59 }
 0x3b2   : > { %v4843_v31 = vadd.f32 %v2093_v6, %v2049_v14  ;;  %v4900_v6 = vsub.f32 %v4776_v43, %v2171_v35 }
 0x3b3   : > { %v2226_v36 = vsel %vm328_vm0, %v2204_v15, 0.0 }
 0x3b4   : > { %v2153_v54 = vsel %vm328_vm0, %v4843_v31, 0.0  ;;  %v2203_v41 = vmul.f32 %v4900_v6, %v4900_v6 }
 0x3b5   : > { %2154 = vadd.xlane.f32.xlu2 %v2153_v54  ;;  %v2131_v14 = vpop.xlane.xlu0 %2130  ;;  %v2205_v54 = vmul.f32 %v4893_v52, %v4893_v52 }
 0x3b6   : > { %v2174_v3 = vmul.f32 %v4853_v27, %v2131_v14  ;;  %v2223_v43 = vsel %vm328_vm0, %v2203_v41, 0.0 }
 0x3b7   : > { %v1842_v38 = vpop.f32.mrf.mxu3 }
 0x3b8   : > { %v4909_v55 = vsub.f32 %v4787_v16, %v2174_v3 }
 0x3ba   : > { %v2206_v63 = vmul.f32 %v4909_v55, %v4909_v55 }
 0x3bc   : > { %v2232_v28 = vsel %vm328_vm0, %v2206_v63, 0.0 }
 0x3bf   : > { %v1845_v39 = vpop.f32.mrf.mxu3 }
 0x3c7   : > { %v1958_v4 = vpop.f32.mrf.mxu3 }
 0x3c8   : > { %v1959_v2 = vadd.f32 %v1958_v4, %v4807_v25 }
 0x3ca   : > { %v4849_v40 = vadd.f32 %v4699_v12, %v1959_v2  ;;  %v1421_v12 = vadd.f32 %v4581_v58, %v4607_v56 }
 0x3cc   : > { %v2132_v29 = vsel %vm328_vm0, %v4849_v40, 0.0  ;;  %v2094_v17 = vmul.f32 %v1612_v7, %v1421_v12 }
 0x3cd   : > { %2133 = vadd.xlane.f32.xlu1 %v2132_v29 }
 0x3cf   : > { %v1961_v9 = vpop.f32.mrf.mxu3 }
 0x3d0   : > { %v1962_v18 = vadd.f32 %v1961_v9, %v4809_v53  ;;  %v2170_v53 = vmul.f32 %v4853_v27, %v2119_v37 }
 0x3d2   : > { %v4858_v25 = vadd.f32 %v4711_v60, %v1962_v18  ;;  %v4876_v33 = vsub.f32 %v4737_v34, %v2170_v53 }
 0x3d4   : > { %v2135_v1 = vsel %vm328_vm0, %v4858_v25, 0.0  ;;  %v2202_v34 = vmul.f32 %v4876_v33, %v4876_v33 }
 0x3d5   : > { %2136 = vadd.xlane.f32.xlu2 %v2135_v1 }
 0x3d6   : > { %v2220_v5 = vsel %vm328_vm0, %v2202_v34, 0.0 }
 0x3d7   : > { %v2074_v61 = vpop.f32.mrf.mxu3 }
 0x3d8   : > { %v2075_v60 = vadd.f32 %v2074_v61, %v1842_v38  ;;  %v2229_v38 = vsel %vm328_vm0, %v2205_v54, 0.0 }
 0x3da   : > { %v4871_v56 = vadd.f32 %v2094_v17, %v2075_v60 }
 0x3dc   : > { %v2156_v0 = vsel %vm328_vm0, %v4871_v56, 0.0 }
 0x3dd   : > { %2157 = vadd.xlane.f32.xlu0 %v2156_v0  ;;  %2218 = vadd.xlane.f32.xlu2 %v2217_v49 }
 0x3df   : > { %v2077_v24 = vpop.f32.mrf.mxu3 }
 0x3e0   : > { %v2078_v58 = vadd.f32 %v2077_v24, %v1845_v39 }
 0x3e2   : > { %v4890_v21 = vadd.f32 %v2095_v51, %v2078_v58 }
 0x3e4   : > { %v2159_v47 = vsel %vm328_vm0, %v4890_v21, 0.0 }
 0x3e5   : > { %2221 = vadd.xlane.f32.xlu0 %v2220_v5  ;;  %2227 = vadd.xlane.f32.xlu2 %v2226_v36 }
 0x3e6   : > { %2160 = vadd.xlane.f32.xlu1 %v2159_v47 }
 0x3ed   : > { %2230 = vadd.xlane.f32.xlu0 %v2229_v38 }
 0x3ee   : > { %2224 = vadd.xlane.f32.xlu1 %v2223_v43 }
 0x3f5   : > { %v2140_v39 = vpop.xlane.xlu0 %2139 }
 0x3f6   : > { %v2177_v23 = vmul.f32 %v4853_v27, %v2140_v39  ;;  %2233 = vadd.xlane.f32.xlu1 %v2232_v28 }
 0x3f8   : > { %v4917_v4 = vsub.f32 %v4813_v45, %v2177_v23 }
 0x3fa   : > { %v2209_v16 = vmul.f32 %v4917_v4, %v4917_v4 }
 0x3fc   : > { %v2241_v2 = vsel %vm328_vm0, %v2209_v16, 0.0 }
 0x3fe   : > { %2242 = vadd.xlane.f32.xlu1 %v2241_v2 }
 0x410   : > { %v2146_v7 = vpop.xlane.xlu2 %2145 }
 0x411   : > { %v2179_v57 = vmul.f32 %v4853_v27, %v2146_v7 }
 0x413   : > { %v4924_v50 = vsub.f32 %v4821_v13, %v2179_v57 }
 0x415   : > { %v2211_v32 = vmul.f32 %v4924_v50, %v4924_v50 }
 0x416   : > { %v2143_v29 = vpop.xlane.xlu1 %2142 }
 0x417   : > { %v2178_v9 = vmul.f32 %v4853_v27, %v2143_v29  ;;  %v2247_v18 = vsel %vm328_vm0, %v2211_v32, 0.0 }
 0x418   : > { %2248 = vadd.xlane.f32.xlu0 %v2247_v18  ;;  %v2149_v62 = vpop.xlane.xlu0 %2148 }
 0x419   : > { %v4930_v45 = vsub.f32 %v4827_v20, %v2178_v9  ;;  %v2180_v12 = vmul.f32 %v4853_v27, %v2149_v62 }
 0x41b   : > { %v2210_v37 = vmul.f32 %v4930_v45, %v4930_v45  ;;  %v4937_v13 = vsub.f32 %v4831_v19, %v2180_v12 }
 0x41d   : > { %v2244_v1 = vsel %vm328_vm0, %v2210_v37, 0.0  ;;  %v2212_v22 = vmul.f32 %v4937_v13, %v4937_v13 }
 0x41e   : > { %2245 = vadd.xlane.f32.xlu2 %v2244_v1 }
 0x41f   : > { %v2250_v20 = vsel %vm328_vm0, %v2212_v22, 0.0 }
 0x420   : > { %v2152_v17 = vpop.xlane.xlu1 %2151  ;;  %2251 = vadd.xlane.f32.xlu1 %v2250_v20 }
 0x421   : > { %v2181_v61 = vmul.f32 %v4853_v27, %v2152_v17 }
 0x423   : > { %v4945_v53 = vsub.f32 %v4837_v10, %v2181_v61  ;;  %v4994_v61 = vld [vmem:[#allocation8 + $0x3] ss:$0 sm:$0xff] }
 0x425   : > { %v2213_v44 = vmul.f32 %v4945_v53, %v4945_v53 }
 0x427   : > { %v2253_v19 = vsel %vm328_vm0, %v2213_v44, 0.0 }
 0x428   : > { %2254 = vadd.xlane.f32.xlu2 %v2253_v19  ;;  %v2155_v60 = vpop.xlane.xlu2 %2154 }
 0x429   : > { %v2182_v42 = vmul.f32 %v4853_v27, %v2155_v60 }
 0x440   : > { %v2134_v8 = vpop.xlane.xlu1 %2133 }
 0x441   : > { %v2175_v46 = vmul.f32 %v4853_v27, %v2134_v8  ;;  %v4998_v8 = vld [vmem:[#allocation8 + $0x4] ss:$0 sm:$0xff] }
 0x443   : > { %v4952_v30 = vsub.f32 %v4849_v40, %v2175_v46  ;;  %v4965_v40 = vsub.f32 %v4843_v31, %v2182_v42 }
 0x445   : > { %v2207_v11 = vmul.f32 %v4952_v30, %v4952_v30 }
 0x447   : > { %v2235_v0 = vsel %vm328_vm0, %v2207_v11, 0.0 }
 0x448   : > { %v2137_v10 = vpop.xlane.xlu2 %2136  ;;  %2236 = vadd.xlane.f32.xlu2 %v2235_v0 }
 0x449   : > { %v2176_v49 = vmul.f32 %v4853_v27, %v2137_v10 }
 0x44b   : > { %v4960_v51 = vsub.f32 %v4858_v25, %v2176_v49  ;;  %v2214_v25 = vmul.f32 %v4965_v40, %v4965_v40 }
 0x44d   : > { %v2208_v24 = vmul.f32 %v4960_v51, %v4960_v51  ;;  %v2256_v31 = vsel %vm328_vm0, %v2214_v25, 0.0 }
 0x44f   : > { %v2238_v26 = vsel %vm328_vm0, %v2208_v24, 0.0 }
 0x450   : > { %2239 = vadd.xlane.f32.xlu0 %v2238_v26  ;;  %v2219_v58 = vpop.xlane.xlu2 %2218  ;;  %v2158_v34 = vpop.xlane.xlu0 %2157 }
 0x451   : > { %v2265_v15 = vmul.f32 %v2219_v58, %v4853_v27  ;;  %v2183_v35 = vmul.f32 %v4853_v27, %v2158_v34 }
 0x453   : > { %v2281_v5 = vadd.f32 1e-12, %v2265_v15  ;;  %v4971_v36 = vsub.f32 %v4871_v56, %v2183_v35 }
 0x455   : > { %2994 = vrsqrt.f32 %v2281_v5  ;;  %v2215_v47 = vmul.f32 %v4971_v36, %v4971_v36  ;;  %vm2303_vm12 = vweird.f32 %v2281_v5 }
 0x457   : > { %v2259_v38 = vsel %vm328_vm0, %v2215_v47, 0.0 }
 0x458   : > { %2257 = vadd.xlane.f32.xlu0 %v2256_v31  ;;  %v2228_v14 = vpop.xlane.xlu2 %2227  ;;  %v2222_v54 = vpop.xlane.xlu0 %2221  ;;  %2260 = vadd.xlane.f32.xlu1 %v2259_v38 }
 0x459   : > { %v2268_v3 = vmul.f32 %v2228_v14, %v4853_v27  ;;  %v2161_v41 = vpop.xlane.xlu1 %2160  ;;  %v2266_v56 = vmul.f32 %v2222_v54, %v4853_v27 }
 0x45a   : > { %v2184_v43 = vmul.f32 %v4853_v27, %v2161_v41 }
 0x45b   : > { %v2995_v63 = vpop.eup %2994  ;;  %v2284_v39 = vadd.f32 1e-12, %v2268_v3  ;;  %v2282_v28 = vadd.f32 1e-12, %v2266_v56 }
 0x45c   : > { %v2298_v23 = vmul.f32 %v2995_v63, %v2281_v5  ;;  %v4983_v16 = vsub.f32 %v4890_v21, %v2184_v43  ;;  %vm2304_vm11 = vweird.f32 %v2995_v63 }
 0x45d   : > { %2996 = vrsqrt.f32 %v2284_v39  ;;  %vm2305_vm13 = vmor %vm2303_vm12, %vm2304_vm11  ;;  %vm2333_vm2 = vweird.f32 %v2284_v39  ;;  %vm2313_vm5 = vweird.f32 %v2282_v28 }
 0x45e   : > { %v2299_v2 = vmul.f32 %v2995_v63, %v2298_v23  ;;  %2998 = vrsqrt.f32 %v2282_v28  ;;  %v2216_v7 = vmul.f32 %v4983_v16, %v4983_v16 }
 0x460   : > { %v2300_v57 = vmul.f32 0.5, %v2299_v2  ;;  %v2262_v29 = vsel %vm328_vm0, %v2216_v7, 0.0  ;;  %v2231_v9 = vpop.xlane.xlu0 %2230 }
 0x461   : > { %2263 = vadd.xlane.f32.xlu2 %v2262_v29  ;;  %v2225_v32 = vpop.xlane.xlu1 %2224  ;;  %v2269_v18 = vmul.f32 %v2231_v9, %v4853_v27 }
 0x462   : > { %v2301_v62 = vsub.f32 1.5, %v2300_v57  ;;  %v2267_v12 = vmul.f32 %v2225_v32, %v4853_v27 }
 0x463   : > { %v2997_v21 = vpop.eup %2996  ;;  %v4990_v37 = vadd.f32 1e-12, %v2269_v18 }
 0x464   : > { %v2999_v1 = vpop.eup %2998  ;;  %v2302_v22 = vmul.f32 %v2995_v63, %v2301_v62  ;;  %v2328_v20 = vmul.f32 %v2997_v21, %v2284_v39  ;;  %v4992_v17 = vadd.f32 1e-12, %v2267_v12  ;;  %vm2334_vm7 = vweird.f32 %v2997_v21 }
 0x465   : > { %v2308_v44 = vmul.f32 %v2999_v1, %v2282_v28  ;;  %3000 = vrsqrt.f32 %v4990_v37  ;;  %vm2314_vm8 = vweird.f32 %v2999_v1  ;;  %vm2335_vm3 = vmor %vm2333_vm2, %vm2334_vm7  ;;  %vm2343_vm14 = vweird.f32 %v4990_v37 }
 0x466   : > { %v2306_v19 = vsel %vm2305_vm13, %v2995_v63, %v2302_v22  ;;  %v2329_v60 = vmul.f32 %v2997_v21, %v2328_v20  ;;  %3002 = vrsqrt.f32 %v4992_v17  ;;  %vm2315_vm9 = vmor %vm2313_vm5, %vm2314_vm8  ;;  %vm2323_vm6 = vweird.f32 %v4992_v17 }
 0x467   : > { %v2457_v46 = vmul.f32 %v2306_v19, %v4863_v48  ;;  %v2309_v11 = vmul.f32 %v2999_v1, %v2308_v44 }
 0x468   : > { %v2330_v0 = vmul.f32 0.5, %v2329_v60 }
 0x469   : > { %v2474_v10 = vmul.f32 %v4994_v61, %v2457_v46  ;;  %v2310_v49 = vmul.f32 0.5, %v2309_v11  ;;  %v2234_v42 = vpop.xlane.xlu1 %2233 }
 0x46a   : > { %v2331_v24 = vsub.f32 1.5, %v2330_v0  ;;  %v2270_v26 = vmul.f32 %v2234_v42, %v4853_v27 }
 0x46b   : > { %v3001_v58 = vpop.eup %3000  ;;  %v2491_v34 = vadd.f32 %v4998_v8, %v2474_v10  ;;  %v2311_v15 = vsub.f32 1.5, %v2310_v49 }
 0x46c   : > { %v3003_v35 = vpop.eup %3002  ;;  %v2332_v5 = vmul.f32 %v2997_v21, %v2331_v24  ;;  %v2338_v48 = vmul.f32 %v3001_v58, %v4990_v37  ;;  %v2286_v25 = vadd.f32 1e-12, %v2270_v26  ;;  %vm2344_vm15 = vweird.f32 %v3001_v58 }
 0x46d   : > { %v2507_v31 = vmax.f32 %v2491_v34, 0.0  ;;  %v2312_v47 = vmul.f32 %v2999_v1, %v2311_v15  ;;  %v2318_v14 = vmul.f32 %v3003_v35, %v4992_v17  ;;  %vm2324_vm4 = vweird.f32 %v3003_v35  ;;  %vm2345_vm10 = vmor %vm2343_vm14, %vm2344_vm15 }
 0x46e   : > { %v2336_v54 = vsel %vm2335_vm3, %v2997_v21, %v2332_v5  ;;  %v2339_v3 = vmul.f32 %v3001_v58, %v2338_v48  ;;  %3004 = vrsqrt.f32 %v2286_v25  ;;  %vm2325_vm1 = vmor %vm2323_vm6, %vm2324_vm4  ;;  %vm2353_vm12 = vweird.f32 %v2286_v25 }
 0x46f   : > { %2523 = vst.msk [vmem:[%s5007_s21] sm:$0xff] %vm328_vm0, %v2507_v31  ;;  %v2460_v41 = vmul.f32 %v2336_v54, %v4879_v59  ;;  %v2316_v38 = vsel %vm2315_vm9, %v2999_v1, %v2312_v47  ;;  %v2319_v56 = vmul.f32 %v3003_v35, %v2318_v14 }
 0x470   : > { %v2458_v43 = vmul.f32 %v2316_v38, %v4876_v33  ;;  %v2340_v63 = vmul.f32 0.5, %v2339_v3 }
 0x471   : > { %v2477_v39 = vmul.f32 %v4994_v61, %v2460_v41  ;;  %v2320_v28 = vmul.f32 0.5, %v2319_v56  ;;  %v2243_v23 = vpop.xlane.xlu1 %2242 }
 0x472   : > { %v2475_v2 = vmul.f32 %v4994_v61, %v2458_v43  ;;  %v2341_v7 = vsub.f32 1.5, %v2340_v63  ;;  %v2273_v57 = vmul.f32 %v2243_v23, %v4853_v27 }
 0x473   : > { %v2494_v29 = vadd.f32 %v4998_v8, %v2477_v39  ;;  %v2321_v9 = vsub.f32 1.5, %v2320_v28 }
 0x474   : > { %v3005_v59 = vpop.eup %3004  ;;  %v2492_v32 = vadd.f32 %v4998_v8, %v2475_v2  ;;  %v2342_v33 = vmul.f32 %v3001_v58, %v2341_v7  ;;  %v2289_v18 = vadd.f32 1e-12, %v2273_v57 }
 0x475   : > { %v2510_v62 = vmax.f32 %v2494_v29, 0.0  ;;  %v2322_v12 = vmul.f32 %v3003_v35, %v2321_v9  ;;  %v2348_v21 = vmul.f32 %v3005_v59, %v2286_v25  ;;  %vm2354_vm11 = vweird.f32 %v3005_v59 }
 0x476   : > { %v2508_v1 = vmax.f32 %v2492_v32, 0.0  ;;  %v2346_v22 = vsel %vm2345_vm10, %v3001_v58, %v2342_v33  ;;  %3006 = vrsqrt.f32 %v2289_v18  ;;  %vm2355_vm13 = vmor %vm2353_vm12, %vm2354_vm11  ;;  %vm2383_vm8 = vweird.f32 %v2289_v18 }
 0x477   : > { %2526 = vst.msk [vmem:[%s5007_s21 + $0x18] sm:$0xff] %vm328_vm0, %v2510_v62  ;;  %v2326_v20 = vsel %vm2325_vm1, %v3003_v35, %v2322_v12  ;;  %v2461_v44 = vmul.f32 %v2346_v22, %v4893_v52  ;;  %v2349_v19 = vmul.f32 %v3005_v59, %v2348_v21 }
 0x478   : > { %2524 = vst.msk [vmem:[%s5007_s21 + $0x8] sm:$0xff] %vm328_vm0, %v2508_v1  ;;  %v2459_v37 = vmul.f32 %v2326_v20, %v4900_v6 }
 0x479   : > { %v2478_v60 = vmul.f32 %v4994_v61, %v2461_v44  ;;  %v2350_v17 = vmul.f32 0.5, %v2349_v19 }
 0x47a   : > { %v2476_v46 = vmul.f32 %v4994_v61, %v2459_v37 }
 0x47b   : > { %v2495_v11 = vadd.f32 %v4998_v8, %v2478_v60  ;;  %v2351_v0 = vsub.f32 1.5, %v2350_v17 }
 0x47c   : > { %v3007_v10 = vpop.eup %3006  ;;  %v2493_v49 = vadd.f32 %v4998_v8, %v2476_v46 }
 0x47d   : > { %v2511_v52 = vmax.f32 %v2495_v11, 0.0  ;;  %v2352_v42 = vmul.f32 %v3005_v59, %v2351_v0  ;;  %v2378_v24 = vmul.f32 %v3007_v10, %v2289_v18  ;;  %vm2384_vm7 = vweird.f32 %v3007_v10 }
 0x47e   : > { %v2509_v26 = vmax.f32 %v2493_v49, 0.0  ;;  %vm2385_vm2 = vmor %vm2383_vm8, %vm2384_vm7 }
 0x47f   : > { %2527 = vst.msk [vmem:[%s5007_s21 + $0x20] sm:$0xff] %vm328_vm0, %v2511_v52  ;;  %v2356_v6 = vsel %vm2355_vm13, %v3005_v59, %v2352_v42  ;;  %v2379_v58 = vmul.f32 %v3007_v10, %v2378_v24 }
 0x480   : > { %2525 = vst.msk [vmem:[%s5007_s21 + $0x10] sm:$0xff] %vm328_vm0, %v2509_v26  ;;  %v2462_v34 = vmul.f32 %v2356_v6, %v4909_v55 }
 0x481   : > { %v2380_v15 = vmul.f32 0.5, %v2379_v58 }
 0x482   : > { %v2479_v35 = vmul.f32 %v4994_v61, %v2462_v34 }
 0x483   : > { %v2381_v5 = vsub.f32 1.5, %v2380_v15 }
 0x484   : > { %v2496_v48 = vadd.f32 %v4998_v8, %v2479_v35 }
 0x485   : > { %v2382_v25 = vmul.f32 %v3007_v10, %v2381_v5 }
 0x486   : > { %v2512_v31 = vmax.f32 %v2496_v48, 0.0 }
 0x487   : > { %v2386_v47 = vsel %vm2385_vm2, %v3007_v10, %v2382_v25 }
 0x488   : > { %2528 = vst.msk [vmem:[%s5007_s21 + $0x28] sm:$0xff] %vm328_vm0, %v2512_v31  ;;  %v2465_v14 = vmul.f32 %v2386_v47, %v4917_v4 }
 0x48a   : > { %v2482_v54 = vmul.f32 %v4994_v61, %v2465_v14 }
 0x48b   : > { %v2249_v55 = vpop.xlane.xlu0 %2248 }
 0x48c   : > { %v2499_v3 = vadd.f32 %v4998_v8, %v2482_v54  ;;  %v2275_v41 = vmul.f32 %v2249_v55, %v4853_v27 }
 0x48e   : > { %v2515_v38 = vmax.f32 %v2499_v3, 0.0  ;;  %v2291_v56 = vadd.f32 1e-12, %v2275_v41 }
 0x490   : > { %2531 = vst.msk [vmem:[%s5007_s21 + $0x40] sm:$0xff] %vm328_vm0, %v2515_v38  ;;  %3008 = vrsqrt.f32 %v2291_v56  ;;  %vm2403_vm5 = vweird.f32 %v2291_v56 }
 0x491   : > { %v2246_v43 = vpop.xlane.xlu2 %2245 }
 0x492   : > { %v2274_v63 = vmul.f32 %v2246_v43, %v4853_v27 }
 0x493   : > { %v2252_v28 = vpop.xlane.xlu1 %2251 }
 0x494   : > { %v2290_v39 = vadd.f32 1e-12, %v2274_v63  ;;  %v2276_v4 = vmul.f32 %v2252_v28, %v4853_v27 }
 0x496   : > { %3010 = vrsqrt.f32 %v2290_v39  ;;  %v3009_v23 = vpop.eup %3008  ;;  %v2292_v2 = vadd.f32 1e-12, %v2276_v4  ;;  %vm2393_vm4 = vweird.f32 %v2290_v39 }
 0x497   : > { %v2398_v7 = vmul.f32 %v3009_v23, %v2291_v56  ;;  %vm2404_vm3 = vweird.f32 %v3009_v23 }
 0x498   : > { %3012 = vrsqrt.f32 %v2292_v2  ;;  %vm2405_vm9 = vmor %vm2403_vm5, %vm2404_vm3  ;;  %vm2413_vm10 = vweird.f32 %v2292_v2 }
 0x499   : > { %v2399_v57 = vmul.f32 %v3009_v23, %v2398_v7 }
 0x49b   : > { %v2400_v9 = vmul.f32 0.5, %v2399_v57  ;;  %v2255_v32 = vpop.xlane.xlu2 %2254 }
 0x49c   : > { %v3011_v29 = vpop.eup %3010  ;;  %v2277_v33 = vmul.f32 %v2255_v32, %v4853_v27 }
 0x49d   : > { %v2388_v59 = vmul.f32 %v3011_v29, %v2290_v39  ;;  %v2401_v18 = vsub.f32 1.5, %v2400_v9  ;;  %vm2394_vm15 = vweird.f32 %v3011_v29 }
 0x49e   : > { %v3013_v12 = vpop.eup %3012  ;;  %v2293_v21 = vadd.f32 1e-12, %v2277_v33  ;;  %vm2395_vm14 = vmor %vm2393_vm4, %vm2394_vm15 }
 0x49f   : > { %v2389_v62 = vmul.f32 %v3011_v29, %v2388_v59  ;;  %v2402_v1 = vmul.f32 %v3009_v23, %v2401_v18  ;;  %v2408_v20 = vmul.f32 %v3013_v12, %v2292_v2  ;;  %vm2414_vm6 = vweird.f32 %v3013_v12 }
 0x4a0   : > { %3014 = vrsqrt.f32 %v2293_v21  ;;  %vm2415_vm1 = vmor %vm2413_vm10, %vm2414_vm6  ;;  %vm2423_vm12 = vweird.f32 %v2293_v21 }
 0x4a1   : > { %v2390_v22 = vmul.f32 0.5, %v2389_v62  ;;  %v2406_v44 = vsel %vm2405_vm9, %v3009_v23, %v2402_v1  ;;  %v2409_v37 = vmul.f32 %v3013_v12, %v2408_v20 }
 0x4a2   : > { %v2467_v60 = vmul.f32 %v2406_v44, %v4924_v50 }
 0x4a3   : > { %v2391_v19 = vsub.f32 1.5, %v2390_v22  ;;  %v2410_v46 = vmul.f32 0.5, %v2409_v37 }
 0x4a4   : > { %v2484_v11 = vmul.f32 %v4994_v61, %v2467_v60 }
 0x4a5   : > { %v2392_v17 = vmul.f32 %v3011_v29, %v2391_v19  ;;  %v2411_v10 = vsub.f32 1.5, %v2410_v46 }
 0x4a6   : > { %v3015_v49 = vpop.eup %3014  ;;  %v2501_v52 = vadd.f32 %v4998_v8, %v2484_v11 }
 0x4a7   : > { %v2396_v0 = vsel %vm2395_vm14, %v3011_v29, %v2392_v17  ;;  %v2412_v24 = vmul.f32 %v3013_v12, %v2411_v10  ;;  %v2418_v26 = vmul.f32 %v3015_v49, %v2293_v21  ;;  %vm2424_vm11 = vweird.f32 %v3015_v49 }
 0x4a8   : > { %v2466_v42 = vmul.f32 %v2396_v0, %v4930_v45  ;;  %v2517_v50 = vmax.f32 %v2501_v52, 0.0  ;;  %vm2425_vm13 = vmor %vm2423_vm12, %vm2424_vm11 }
 0x4a9   : > { %v2416_v58 = vsel %vm2415_vm1, %v3013_v12, %v2412_v24  ;;  %v2419_v34 = vmul.f32 %v3015_v49, %v2418_v26 }
 0x4aa   : > { %v2483_v6 = vmul.f32 %v4994_v61, %v2466_v42  ;;  %2533 = vst.msk [vmem:[%s5007_s21 + $0x50] sm:$0xff] %vm328_vm0, %v2517_v50  ;;  %v2468_v35 = vmul.f32 %v2416_v58, %v4937_v13 }
 0x4ab   : > { %v2420_v5 = vmul.f32 0.5, %v2419_v34 }
 0x4ac   : > { %v2500_v15 = vadd.f32 %v4998_v8, %v2483_v6  ;;  %v2485_v45 = vmul.f32 %v4994_v61, %v2468_v35 }
 0x4ad   : > { %v2421_v25 = vsub.f32 1.5, %v2420_v5 }
 0x4ae   : > { %v2516_v48 = vmax.f32 %v2500_v15, 0.0  ;;  %v2502_v31 = vadd.f32 %v4998_v8, %v2485_v45 }
 0x4af   : > { %v2422_v47 = vmul.f32 %v3015_v49, %v2421_v25 }
 0x4b0   : > { %2532 = vst.msk [vmem:[%s5007_s21 + $0x48] sm:$0xff] %vm328_vm0, %v2516_v48  ;;  %v2518_v14 = vmax.f32 %v2502_v31, 0.0 }
 0x4b1   : > { %v2426_v54 = vsel %vm2425_vm13, %v3015_v49, %v2422_v47 }
 0x4b2   : > { %2534 = vst.msk [vmem:[%s5007_s21 + $0x58] sm:$0xff] %vm328_vm0, %v2518_v14  ;;  %v2469_v13 = vmul.f32 %v2426_v54, %v4945_v53 }
 0x4b4   : > { %v2486_v55 = vmul.f32 %v4994_v61, %v2469_v13 }
 0x4b6   : > { %v2503_v3 = vadd.f32 %v4998_v8, %v2486_v55 }
 0x4b8   : > { %v2519_v41 = vmax.f32 %v2503_v3, 0.0 }
 0x4ba   : > { %2535 = vst.msk [vmem:[%s5007_s21 + $0x60] sm:$0xff] %vm328_vm0, %v2519_v41 }
 0x4bb   : > { %v2237_v38 = vpop.xlane.xlu2 %2236 }
 0x4bc   : > { %v2271_v56 = vmul.f32 %v2237_v38, %v4853_v27 }
 0x4be   : > { %v2287_v43 = vadd.f32 1e-12, %v2271_v56 }
 0x4c0   : > { %3016 = vrsqrt.f32 %v2287_v43  ;;  %vm2363_vm8 = vweird.f32 %v2287_v43 }
 0x4c3   : > { %v2240_v63 = vpop.xlane.xlu0 %2239 }
 0x4c4   : > { %v2272_v39 = vmul.f32 %v2240_v63, %v4853_v27 }
 0x4c6   : > { %v3017_v28 = vpop.eup %3016  ;;  %v2288_v4 = vadd.f32 1e-12, %v2272_v39 }
 0x4c7   : > { %v2358_v23 = vmul.f32 %v3017_v28, %v2287_v43  ;;  %vm2364_vm7 = vweird.f32 %v3017_v28 }
 0x4c8   : > { %3018 = vrsqrt.f32 %v2288_v4  ;;  %vm2365_vm2 = vmor %vm2363_vm8, %vm2364_vm7  ;;  %vm2373_vm5 = vweird.f32 %v2288_v4 }
 0x4c9   : > { %v2359_v53 = vmul.f32 %v3017_v28, %v2358_v23 }
 0x4cb   : > { %v2360_v2 = vmul.f32 0.5, %v2359_v53  ;;  %v2258_v7 = vpop.xlane.xlu0 %2257  ;;  %v2261_v29 = vpop.xlane.xlu1 %2260 }
 0x4cc   : > { %v2278_v9 = vmul.f32 %v2258_v7, %v4853_v27  ;;  %v2279_v32 = vmul.f32 %v2261_v29, %v4853_v27 }
 0x4cd   : > { %v2361_v57 = vsub.f32 1.5, %v2360_v2 }
 0x4ce   : > { %v3019_v59 = vpop.eup %3018  ;;  %v2294_v62 = vadd.f32 1e-12, %v2278_v9  ;;  %v2295_v12 = vadd.f32 1e-12, %v2279_v32 }
 0x4cf   : > { %v2362_v33 = vmul.f32 %v3017_v28, %v2361_v57  ;;  %v2368_v18 = vmul.f32 %v3019_v59, %v2288_v4  ;;  %vm2374_vm3 = vweird.f32 %v3019_v59 }
 0x4d0   : > { %3020 = vrsqrt.f32 %v2294_v62  ;;  %vm2375_vm9 = vmor %vm2373_vm5, %vm2374_vm3  ;;  %vm2433_vm14 = vweird.f32 %v2294_v62  ;;  %vm2443_vm6 = vweird.f32 %v2295_v12 }
 0x4d1   : > { %v2366_v21 = vsel %vm2365_vm2, %v3017_v28, %v2362_v33  ;;  %v2369_v1 = vmul.f32 %v3019_v59, %v2368_v18  ;;  %3022 = vrsqrt.f32 %v2295_v12 }
 0x4d2   : > { %v2463_v22 = vmul.f32 %v2366_v21, %v4952_v30 }
 0x4d3   : > { %v2370_v20 = vmul.f32 0.5, %v2369_v1 }
 0x4d4   : > { %v2480_v44 = vmul.f32 %v4994_v61, %v2463_v22  ;;  %v2264_v19 = vpop.xlane.xlu2 %2263 }
 0x4d5   : > { %v2371_v37 = vsub.f32 1.5, %v2370_v20  ;;  %v2280_v60 = vmul.f32 %v2264_v19, %v4853_v27 }
 0x4d6   : > { %v2497_v17 = vadd.f32 %v4998_v8, %v2480_v44  ;;  %v3021_v46 = vpop.eup %3020 }
 0x4d7   : > { %v2372_v11 = vmul.f32 %v3019_v59, %v2371_v37  ;;  %v2296_v0 = vadd.f32 1e-12, %v2280_v60  ;;  %v3023_v10 = vpop.eup %3022  ;;  %v2428_v30 = vmul.f32 %v3021_v46, %v2294_v62  ;;  %vm2434_vm15 = vweird.f32 %v3021_v46 }
 0x4d8   : > { %v2513_v49 = vmax.f32 %v2497_v17, 0.0  ;;  %v2438_v42 = vmul.f32 %v3023_v10, %v2295_v12  ;;  %vm2444_vm4 = vweird.f32 %v3023_v10  ;;  %vm2435_vm10 = vmor %vm2433_vm14, %vm2434_vm15 }
 0x4d9   : > { %v2376_v52 = vsel %vm2375_vm9, %v3019_v59, %v2372_v11  ;;  %3024 = vrsqrt.f32 %v2296_v0  ;;  %v2429_v26 = vmul.f32 %v3021_v46, %v2428_v30  ;;  %vm2445_vm1 = vmor %vm2443_vm6, %vm2444_vm4  ;;  %vm2453_vm12 = vweird.f32 %v2296_v0 }
 0x4da   : > { %2529 = vst.msk [vmem:[%s5007_s21 + $0x30] sm:$0xff] %vm328_vm0, %v2513_v49  ;;  %v2464_v24 = vmul.f32 %v2376_v52, %v4960_v51  ;;  %v2439_v50 = vmul.f32 %v3023_v10, %v2438_v42 }
 0x4db   : > { %v2430_v6 = vmul.f32 0.5, %v2429_v26 }
 0x4dc   : > { %v2481_v27 = vmul.f32 %v4994_v61, %v2464_v24  ;;  %v2440_v58 = vmul.f32 0.5, %v2439_v50 }
 0x4dd   : > { %v2431_v15 = vsub.f32 1.5, %v2430_v6 }
 0x4de   : > { %v2498_v34 = vadd.f32 %v4998_v8, %v2481_v27  ;;  %v2441_v5 = vsub.f32 1.5, %v2440_v58 }
 0x4df   : > { %v3025_v35 = vpop.eup %3024  ;;  %v2432_v45 = vmul.f32 %v3021_v46, %v2431_v15 }
 0x4e0   : > { %v2514_v48 = vmax.f32 %v2498_v34, 0.0  ;;  %v2448_v25 = vmul.f32 %v3025_v35, %v2296_v0  ;;  %v2442_v31 = vmul.f32 %v3023_v10, %v2441_v5  ;;  %vm2454_vm11 = vweird.f32 %v3025_v35 }
 0x4e1   : > { %v2436_v51 = vsel %vm2435_vm10, %v3021_v46, %v2432_v45  ;;  %vm2455_vm13 = vmor %vm2453_vm12, %vm2454_vm11 }
 0x4e2   : > { %2530 = vst.msk [vmem:[%s5007_s21 + $0x38] sm:$0xff] %vm328_vm0, %v2514_v48  ;;  %v2449_v47 = vmul.f32 %v3025_v35, %v2448_v25  ;;  %v2446_v14 = vsel %vm2445_vm1, %v3023_v10, %v2442_v31  ;;  %v2470_v54 = vmul.f32 %v2436_v51, %v4965_v40 }
 0x4e3   : > { %v2471_v13 = vmul.f32 %v2446_v14, %v4971_v36 }
 0x4e4   : > { %v2450_v55 = vmul.f32 0.5, %v2449_v47  ;;  %v2487_v3 = vmul.f32 %v4994_v61, %v2470_v54 }
 0x4e5   : > { %v2488_v41 = vmul.f32 %v4994_v61, %v2471_v13 }
 0x4e6   : > { %v2451_v38 = vsub.f32 1.5, %v2450_v55  ;;  %v2504_v56 = vadd.f32 %v4998_v8, %v2487_v3 }
 0x4e7   : > { %v2505_v43 = vadd.f32 %v4998_v8, %v2488_v41 }
 0x4e8   : > { %v2452_v63 = vmul.f32 %v3025_v35, %v2451_v38  ;;  %v2520_v40 = vmax.f32 %v2504_v56, 0.0 }
 0x4e9   : > { %v2521_v36 = vmax.f32 %v2505_v43, 0.0 }
 0x4ea   : > { %v2456_v39 = vsel %vm2455_vm13, %v3025_v35, %v2452_v63  ;;  %2536 = vst.msk [vmem:[%s5007_s21 + $0x68] sm:$0xff] %vm328_vm0, %v2520_v40 }
 0x4eb   : > { %v2472_v28 = vmul.f32 %v2456_v39, %v4983_v16  ;;  %2537 = vst.msk [vmem:[%s5007_s21 + $0x70] sm:$0xff] %vm328_vm0, %v2521_v36 }
 0x4ed   : > { %v2489_v4 = vmul.f32 %v4994_v61, %v2472_v28 }
 0x4ef   : > { %v2506_v23 = vadd.f32 %v4998_v8, %v2489_v4 }
 0x4f1   : > { %v2522_v53 = vmax.f32 %v2506_v23, 0.0 }
 0x4f3   : > { %2538 = vst.msk [vmem:[%s5007_s21 + $0x78] sm:$0xff] %vm328_vm0, %v2522_v53 }
 0x4f4   : > { %3175 = shalt.err (!%p3172_p11)
}
 0x4f5   : > { %s3233_s23 = smov 128   ;;  %s3234_s0 = smov 8  }
 0x4f6   : > { %2826 = dma.vmem_to_hbm [thread:$0]  (%p3329_p3), %s2554_s19, 2048, %s2556_s27, %s2540_s28, %s3233_s23, %s3233_s23, %s3234_s0  }
 0x4f7 PF: > { %s2570_s30 = sand.u32 1, %s3214_s15   ;;  %p5226_p12 = scmp.ge.s32.totalorder %s3226_s18, 2 }
 0x4f8   : > { %s2571_s26 = scalar_lea.sflag [#allocation4], %s2570_s30 }
 0x4f9   : > { %p2843_p13 = pnand %p5226_p12, %p3295_p6 }
 0x4fb   : > { %p2844_p0 = pneg %p2843_p13 }
 0x4fd   : > { %3209 = dma.done.wait (%p2844_p0), %s2571_s26, 2048  }
 0x4fe   : > { %3211 = vsyncadd (%p2844_p0), %s2571_s26, 4294965248  ;;  %p21_p5 = scmp.ge.s32.totalorder %s3319_s10, 4   ;;  %s5227_s15 = smov %s3218_s16 }
 0x4ff   : > { %s5228_s16 = smov %s3222_s17  ;;  %s5229_s17 = smov %s3335_s14 }
 0x500   : > { %s5230_s18 = smov %s3319_s10  ;;  %23 = sbr.rel (!%p21_p5) target bundleno = 12 (0xc), region = 104 }
 0x505   :  { %2577 = vsyncpa [#allocation3], 1 }
 0x506   :  { %2579 = vsyncpa [#allocation3 + $0x1], 1 }
 0x507   :  { %2580 = vsyncpa [#allocation6], 1 }
 0x508   :  { %2582 = vsyncpa [#allocation6 + $0x1], 1 }
 0x509   :  { %2583 = vsyncpa [#allocation9], 1 }
 0x50a   :  { %2584 = vsyncpa [#allocation4], 1 }
 0x50b   :  { %2586 = vsyncpa [#allocation4 + $0x1], 1 }

</bundles_post_ra>
